<compile_context>
chip_gen: v7x
topology: tpu7x:2x2x1
jax: 0.10.0
libtpu: 0.0.40
codegen_flags: <defaults>
</compile_context>

<pallas_src>
import functools

import jax
import jax.numpy as jnp
from jax import lax
from jax.experimental import pallas as pl
from jax.experimental.pallas import tpu as pltpu

FC1_DIMS = 1024
FC2_DIMS = 512
HIDDEN_STATE_SIZE = 32


def _round_up(n, m):
    return ((n + m - 1) // m) * m


# ----------------------------------------------------------------------------
# Kernel: whole rollout in one invocation; recurrence via in-kernel loop.
# ----------------------------------------------------------------------------
def _dqn_rollout_kernel(x_ref, h0_ref, w1_ref, b1_ref, w2_ref, b2_ref,
                        w3_ref, b3_ref, y_ref):
    T = x_ref.shape[0]

    w1 = w1_ref[...]   # [Cp, 1024] bf16 (merged state+hidden rows)
    b1 = b1_ref[...]   # [1, 1024]  f32
    w2 = w2_ref[...]   # [1024, 512] bf16
    b2 = b2_ref[...]   # [1, 512]   f32
    w3 = w3_ref[...]   # [512, Cp]  bf16 (zero cols beyond d_out)
    b3 = b3_ref[...]   # [1, Cp]    f32  (zero beyond d_out)

    def step(t, carry):
        # carry: previous padded output row (f32). Its state lanes are exactly
        # zero, so adding the lane-embedded state merges x[t] into the row.
        c = carry + x_ref[t].astype(jnp.float32)                    # [Bp, Cp]
        a1 = jnp.dot(c.astype(jnp.bfloat16), w1,
                     preferred_element_type=jnp.float32) + b1
        h1 = jnp.maximum(a1, 0.0)
        a2 = jnp.dot(h1.astype(jnp.bfloat16), w2,
                     preferred_element_type=jnp.float32) + b2
        h2 = jnp.maximum(a2, 0.0)
        y = jnp.dot(h2.astype(jnp.bfloat16), w3,
                    preferred_element_type=jnp.float32) + b3        # [Bp, Cp]
        y_ref[t] = y            # lane-dense store of the padded output row
        return y

    if T <= 16:
        carry = h0_ref[...]
        for t in range(T):      # small static T: fully unrolled
            carry = step(t, carry)
    else:
        lax.fori_loop(0, T, step, h0_ref[...])


# ----------------------------------------------------------------------------
# One-time weight preparation (bf16 cast, fc1 merge, fc3 lane padding).
# Carry/output lane layout: [actions | hidden | state | zero-pad] of width Cp.
# ----------------------------------------------------------------------------
def prepare_params(params, *, data_shape, num_actions):
    w1, b1, w2, b2, w3, b3 = params
    H = HIDDEN_STATE_SIZE
    d_out = num_actions + H
    Cp = _round_up(d_out + data_shape, 128)

    w1_bf = w1.astype(jnp.bfloat16)
    w1m = jnp.zeros((Cp, FC1_DIMS), jnp.bfloat16)
    # hidden rows go where the hidden lanes of the carry live
    w1m = w1m.at[num_actions:d_out].set(w1_bf[data_shape:data_shape + H])
    # state rows go where the state lanes of the carry live
    w1m = w1m.at[d_out:d_out + data_shape].set(w1_bf[:data_shape])

    w2b = w2.astype(jnp.bfloat16)

    w3p = jnp.zeros((FC2_DIMS, Cp), jnp.bfloat16)
    w3p = w3p.at[:, :d_out].set(w3.astype(jnp.bfloat16))

    b1r = b1.reshape(1, -1).astype(jnp.float32)
    b2r = b2.reshape(1, -1).astype(jnp.float32)
    b3r = jnp.zeros((1, Cp), jnp.float32).at[0, :d_out].set(b3.astype(jnp.float32))

    return (w1m, b1r, w2b, b2r, w3p, b3r)


# ----------------------------------------------------------------------------
# Rollout: T recurrent steps in a single pallas_call / single grid step.
# ----------------------------------------------------------------------------
@functools.partial(jax.jit, static_argnames=("num_actions",))
def dqn_rollout(states, hidden0, prepped, *, num_actions):
    """states: [T, B, Ds] f32, hidden0: [B, 32] f32.
    Returns (actions [T, B, num_actions], hiddens [T, B, 32])."""
    w1m, b1r, w2b, b2r, w3p, b3r = prepped
    T, B, Ds = states.shape
    H = HIDDEN_STATE_SIZE
    d_out = num_actions + H
    Cp = w1m.shape[0]
    Bp = _round_up(max(B, 8), 8)

    # State embedded (bf16) into the carry lane layout at [d_out, d_out+Ds).
    x_emb = jnp.zeros((T, Bp, Cp), jnp.bfloat16)
    x_emb = x_emb.at[:, :B, d_out:d_out + Ds].set(states.astype(jnp.bfloat16))

    # Initial hidden embedded into the carry layout (padded output row).
    h0 = jnp.zeros((Bp, Cp), jnp.float32)
    h0 = h0.at[:B, num_actions:d_out].set(hidden0.astype(jnp.float32))

    def const_spec(arr):
        nd = arr.ndim
        return pl.BlockSpec(arr.shape, lambda i, nd=nd: (0,) * nd)

    y_seq = pl.pallas_call(
        _dqn_rollout_kernel,
        out_shape=jax.ShapeDtypeStruct((T, Bp, Cp), jnp.float32),
        grid_spec=pltpu.PrefetchScalarGridSpec(
            num_scalar_prefetch=0,
            grid=(1,),                      # single invocation: all steps inside
            in_specs=[
                const_spec(x_emb),          # whole state sequence in VMEM
                const_spec(h0),             # initial carry
                const_spec(w1m), const_spec(b1r),
                const_spec(w2b), const_spec(b2r),
                const_spec(w3p), const_spec(b3r),
            ],
            out_specs=pl.BlockSpec((T, Bp, Cp), lambda i: (0, 0, 0)),
        ),
        compiler_params=pltpu.CompilerParams(
            dimension_semantics=("arbitrary",),
        ),
    )(x_emb, h0, w1m, b1r, w2b, b2r, w3p, b3r)

    actions = y_seq[:, :B, :num_actions]
    hiddens = y_seq[:, :B, num_actions:d_out]
    return actions, hiddens


def dqn_forward(state, hidden_state, prepped, *, num_actions):
    """Exact DQN.forward(state, hidden) -> (actions, new_hidden) semantics."""
    actions, hiddens = dqn_rollout(state[None], hidden_state, prepped,
                                   num_actions=num_actions)
    return actions[0], hiddens[0]


# ----------------------------------------------------------------------------
# Synthetic init (matches nn.Linear fan-in init; weights stored as [in, out]).
# ----------------------------------------------------------------------------
def init_params(key, data_shape, num_actions):
    input_shape = data_shape + HIDDEN_STATE_SIZE
    output_shape = num_actions + HIDDEN_STATE_SIZE
    keys = jax.random.split(key, 6)

    def linear(kw, kb, fan_in, fan_out):
        bound = 1.0 / jnp.sqrt(jnp.float32(fan_in))
        w = jax.random.uniform(kw, (fan_in, fan_out), jnp.float32, -bound, bound)
        b = jax.random.uniform(kb, (fan_out,), jnp.float32, -bound, bound)
        return w, b

    w1, b1 = linear(keys[0], keys[1], input_shape, FC1_DIMS)
    w2, b2 = linear(keys[2], keys[3], FC1_DIMS, FC2_DIMS)
    w3, b3 = linear(keys[4], keys[5], FC2_DIMS, output_shape)
    return (w1, b1, w2, b2, w3, b3)


# ----------------------------------------------------------------------------
# Pure-JAX reference with identical bf16 quantization (f32 accumulation).
# ----------------------------------------------------------------------------
def _reference_rollout(states, hidden0, params, num_actions):
    w1, b1, w2, b2, w3, b3 = params

    def bdot(a, b):
        return jnp.dot(a.astype(jnp.bfloat16), b.astype(jnp.bfloat16),
                       preferred_element_type=jnp.float32)

    h = hidden0.astype(jnp.float32)
    acts, hids = [], []
    for t in range(states.shape[0]):
        x = jnp.concatenate([states[t], h], axis=1)
        h1 = jnp.maximum(bdot(x, w1) + b1, 0.0)
        h2 = jnp.maximum(bdot(h1, w2) + b2, 0.0)
        y = bdot(h2, w3) + b3
        acts.append(y[:, :num_actions])
        h = y[:, num_actions:]
        hids.append(h)
    return jnp.stack(acts), jnp.stack(hids)


if __name__ == "__main__":
    key = jax.random.PRNGKey(0)
    k_params, k_state = jax.random.split(key)

    batch = 2
    data_shape = 16          # state_shape[0]
    num_actions = 4
    seq_len = 8

    params = init_params(k_params, data_shape, num_actions)
    prepped = prepare_params(params, data_shape=data_shape, num_actions=num_actions)

    states = jax.random.normal(k_state, (seq_len, batch, data_shape), jnp.float32)
    hidden0 = jnp.zeros((batch, HIDDEN_STATE_SIZE), jnp.float32)  # get_batch_hidden_state

    # Single-step forward (module semantics).
    actions1, hidden1 = dqn_forward(states[0], hidden0, prepped,
                                    num_actions=num_actions)
    jax.block_until_ready((actions1, hidden1))

    # Multi-step rollout: one kernel invocation, weights resident throughout.
    actions_seq, hidden_seq = dqn_rollout(states, hidden0, prepped,
                                          num_actions=num_actions)
    jax.block_until_ready((actions_seq, hidden_seq))

    ref_actions, ref_hiddens = _reference_rollout(states, hidden0, params, num_actions)

    assert actions1.shape == (batch, num_actions)
    assert hidden1.shape == (batch, HIDDEN_STATE_SIZE)
    assert actions_seq.shape == (seq_len, batch, num_actions)
    assert hidden_seq.shape == (seq_len, batch, HIDDEN_STATE_SIZE)
    assert jnp.allclose(actions1, ref_actions[0], atol=2e-3, rtol=2e-3)
    assert jnp.allclose(hidden1, ref_hiddens[0], atol=2e-3, rtol=2e-3)
    assert jnp.allclose(actions_seq, ref_actions, atol=2e-3, rtol=2e-3)
    assert jnp.allclose(hidden_seq, ref_hiddens, atol=2e-3, rtol=2e-3)

    print("KERNEL_OK")
</pallas_src>

<mosaic_0001>
module attributes {stable_mosaic.version = 11 : i64} {
  func.func @_dqn_rollout_kernel(%arg0: i32, %arg1: memref<1x8x128xbf16, #tpu.memory_space<vmem>>, %arg2: memref<8x128xf32, #tpu.memory_space<vmem>>, %arg3: memref<128x1024xbf16, #tpu.memory_space<vmem>>, %arg4: memref<1x1024xf32, #tpu.memory_space<vmem>>, %arg5: memref<1024x512xbf16, #tpu.memory_space<vmem>>, %arg6: memref<1x512xf32, #tpu.memory_space<vmem>>, %arg7: memref<512x128xbf16, #tpu.memory_space<vmem>>, %arg8: memref<1x128xf32, #tpu.memory_space<vmem>>, %arg9: memref<1x8x128xf32, #tpu.memory_space<vmem>>) attributes {dimension_semantics = [#tpu.dimension_semantics<arbitrary>], iteration_bounds = array<i64: 1>, scalar_prefetch = 0 : i64, scratch_operands = 0 : i64, tpu.core_type = #tpu.core_type<tc>, window_params = [{pipeline_mode = #tpu.pipeline_mode<synchronous>, transform_indices = @transform_0, window_bounds = array<i64: 1, 8, 128>}, {pipeline_mode = #tpu.pipeline_mode<synchronous>, transform_indices = @transform_1, window_bounds = array<i64: 8, 128>}, {pipeline_mode = #tpu.pipeline_mode<synchronous>, transform_indices = @transform_2, window_bounds = array<i64: 128, 1024>}, {pipeline_mode = #tpu.pipeline_mode<synchronous>, transform_indices = @transform_3, window_bounds = array<i64: 1, 1024>}, {pipeline_mode = #tpu.pipeline_mode<synchronous>, transform_indices = @transform_4, window_bounds = array<i64: 1024, 512>}, {pipeline_mode = #tpu.pipeline_mode<synchronous>, transform_indices = @transform_5, window_bounds = array<i64: 1, 512>}, {pipeline_mode = #tpu.pipeline_mode<synchronous>, transform_indices = @transform_6, window_bounds = array<i64: 512, 128>}, {pipeline_mode = #tpu.pipeline_mode<synchronous>, transform_indices = @transform_7, window_bounds = array<i64: 1, 128>}, {pipeline_mode = #tpu.pipeline_mode<synchronous>, transform_indices = @transform_8, window_bounds = array<i64: 1, 8, 128>}]} {
    %c0 = arith.constant 0 : index
    %c0_0 = arith.constant 0 : index
    %0 = vector.load %arg3[%c0, %c0_0] : memref<128x1024xbf16, #tpu.memory_space<vmem>>, vector<128x1024xbf16>
    %c0_1 = arith.constant 0 : index
    %c0_2 = arith.constant 0 : index
    %1 = vector.load %arg4[%c0_1, %c0_2] : memref<1x1024xf32, #tpu.memory_space<vmem>>, vector<1x1024xf32>
    %c0_3 = arith.constant 0 : index
    %c0_4 = arith.constant 0 : index
    %2 = vector.load %arg5[%c0_3, %c0_4] : memref<1024x512xbf16, #tpu.memory_space<vmem>>, vector<1024x512xbf16>
    %c0_5 = arith.constant 0 : index
    %c0_6 = arith.constant 0 : index
    %3 = vector.load %arg6[%c0_5, %c0_6] : memref<1x512xf32, #tpu.memory_space<vmem>>, vector<1x512xf32>
    %c0_7 = arith.constant 0 : index
    %c0_8 = arith.constant 0 : index
    %4 = vector.load %arg7[%c0_7, %c0_8] : memref<512x128xbf16, #tpu.memory_space<vmem>>, vector<512x128xbf16>
    %c0_9 = arith.constant 0 : index
    %c0_10 = arith.constant 0 : index
    %5 = vector.load %arg8[%c0_9, %c0_10] : memref<1x128xf32, #tpu.memory_space<vmem>>, vector<1x128xf32>
    %c0_11 = arith.constant 0 : index
    %c0_12 = arith.constant 0 : index
    %6 = vector.load %arg2[%c0_11, %c0_12] : memref<8x128xf32, #tpu.memory_space<vmem>>, vector<8x128xf32>
    %c0_13 = arith.constant 0 : index
    %c0_14 = arith.constant 0 : index
    %c0_15 = arith.constant 0 : index
    %7 = vector.load %arg1[%c0_13, %c0_14, %c0_15] : memref<1x8x128xbf16, #tpu.memory_space<vmem>>, vector<1x8x128xbf16>
    %8 = vector.shape_cast %7 : vector<1x8x128xbf16> to vector<8x128xbf16>
    %9 = arith.extf %8 : vector<8x128xbf16> to vector<8x128xf32>
    %10 = arith.addf %6, %9 : vector<8x128xf32>
    %11 = arith.truncf %10 : vector<8x128xf32> to vector<8x128xbf16>
    %cst = arith.constant dense<0.000000e+00> : vector<8x1024xf32>
    %12 = tpu.matmul %11, %0, %cst {dimension_numbers = #tpu.dot_dimension_numbers<[1], [0], [0], [1], [0, 0, 1, 1], [], []>} : vector<8x128xbf16>, vector<128x1024xbf16>, vector<8x1024xf32> -> vector<8x1024xf32>
    %13 = vector.broadcast %1 : vector<1x1024xf32> to vector<8x1024xf32>
    %14 = arith.addf %12, %13 : vector<8x1024xf32>
    %cst_16 = arith.constant 0.000000e+00 : f32
    %15 = vector.broadcast %cst_16 : f32 to vector<8x1024xf32>
    %16 = arith.maximumf %14, %15 : vector<8x1024xf32>
    %17 = arith.truncf %16 : vector<8x1024xf32> to vector<8x1024xbf16>
    %cst_17 = arith.constant dense<0.000000e+00> : vector<8x512xf32>
    %18 = tpu.matmul %17, %2, %cst_17 {dimension_numbers = #tpu.dot_dimension_numbers<[1], [0], [0], [1], [0, 0, 1, 1], [], []>} : vector<8x1024xbf16>, vector<1024x512xbf16>, vector<8x512xf32> -> vector<8x512xf32>
    %19 = vector.broadcast %3 : vector<1x512xf32> to vector<8x512xf32>
    %20 = arith.addf %18, %19 : vector<8x512xf32>
    %cst_18 = arith.constant 0.000000e+00 : f32
    %21 = vector.broadcast %cst_18 : f32 to vector<8x512xf32>
    %22 = arith.maximumf %20, %21 : vector<8x512xf32>
    %23 = arith.truncf %22 : vector<8x512xf32> to vector<8x512xbf16>
    %cst_19 = arith.constant dense<0.000000e+00> : vector<8x128xf32>
    %24 = tpu.matmul %23, %4, %cst_19 {dimension_numbers = #tpu.dot_dimension_numbers<[1], [0], [0], [1], [0, 0, 1, 1], [], []>} : vector<8x512xbf16>, vector<512x128xbf16>, vector<8x128xf32> -> vector<8x128xf32>
    %25 = vector.broadcast %5 : vector<1x128xf32> to vector<8x128xf32>
    %26 = arith.addf %24, %25 : vector<8x128xf32>
    %c0_20 = arith.constant 0 : index
    %c0_21 = arith.constant 0 : index
    %c0_22 = arith.constant 0 : index
    %27 = vector.load %arg9[%c0_20, %c0_21, %c0_22] : memref<1x8x128xf32, #tpu.memory_space<vmem>>, vector<1x8x128xf32>
    %28 = vector.shape_cast %27 : vector<1x8x128xf32> to vector<8x128xf32>
    %29 = vector.shape_cast %26 : vector<8x128xf32> to vector<1x8x128xf32>
    tpu.vector_store %arg9[%c0_20, %c0_21, %c0_22], %29 {strides = array<i32>} : memref<1x8x128xf32, #tpu.memory_space<vmem>>, vector<1x8x128xf32>,
    return
  }
  func.func @transform_0(%arg0: i32) -> (i32, i32, i32) {
    %c0_i32 = arith.constant 0 : i32
    %c0_i32_0 = arith.constant 0 : i32
    %c0_i32_1 = arith.constant 0 : i32
    %c0_i32_2 = arith.constant 0 : i32
    return %c0_i32, %c0_i32_0, %c0_i32_1 : i32, i32, i32
  }
  func.func @transform_1(%arg0: i32) -> (i32, i32) {
    %c0_i32 = arith.constant 0 : i32
    %c0_i32_0 = arith.constant 0 : i32
    %c0_i32_1 = arith.constant 0 : i32
    return %c0_i32, %c0_i32_0 : i32, i32
  }
  func.func @transform_2(%arg0: i32) -> (i32, i32) {
    %c0_i32 = arith.constant 0 : i32
    %c0_i32_0 = arith.constant 0 : i32
    %c0_i32_1 = arith.constant 0 : i32
    return %c0_i32, %c0_i32_0 : i32, i32
  }
  func.func @transform_3(%arg0: i32) -> (i32, i32) {
    %c0_i32 = arith.constant 0 : i32
    %c0_i32_0 = arith.constant 0 : i32
    %c0_i32_1 = arith.constant 0 : i32
    return %c0_i32, %c0_i32_0 : i32, i32
  }
  func.func @transform_4(%arg0: i32) -> (i32, i32) {
    %c0_i32 = arith.constant 0 : i32
    %c0_i32_0 = arith.constant 0 : i32
    %c0_i32_1 = arith.constant 0 : i32
    return %c0_i32, %c0_i32_0 : i32, i32
  }
  func.func @transform_5(%arg0: i32) -> (i32, i32) {
    %c0_i32 = arith.constant 0 : i32
    %c0_i32_0 = arith.constant 0 : i32
    %c0_i32_1 = arith.constant 0 : i32
    return %c0_i32, %c0_i32_0 : i32, i32
  }
  func.func @transform_6(%arg0: i32) -> (i32, i32) {
    %c0_i32 = arith.constant 0 : i32
    %c0_i32_0 = arith.constant 0 : i32
    %c0_i32_1 = arith.constant 0 : i32
    return %c0_i32, %c0_i32_0 : i32, i32
  }
  func.func @transform_7(%arg0: i32) -> (i32, i32) {
    %c0_i32 = arith.constant 0 : i32
    %c0_i32_0 = arith.constant 0 : i32
    %c0_i32_1 = arith.constant 0 : i32
    return %c0_i32, %c0_i32_0 : i32, i32
  }
  func.func @transform_8(%arg0: i32) -> (i32, i32, i32) {
    %c0_i32 = arith.constant 0 : i32
    %c0_i32_0 = arith.constant 0 : i32
    %c0_i32_1 = arith.constant 0 : i32
    %c0_i32_2 = arith.constant 0 : i32
    return %c0_i32, %c0_i32_0, %c0_i32_1 : i32, i32, i32
  }
}

</mosaic_0001>

<bundles_post_ra>
// kernel: dqn_rollout.1
= control target key start
LH: loop header
LB: loop body
LE: loop exit
PB: predicated region body
PF: predicated region fallthrough
CT: control target
= control target key end

     0   :  { %13 = vsyncpa [#allocation3], 0  ;;  %s4017_s0 = inlined_call_operand.vmem [shape: bf16[1,8,128], index: 0, kind: input, shape index: {}]   ;;  %s4018_s1 = inlined_call_operand.vmem [shape: f32[8,128], index: 1, kind: input, shape index: {}]   ;;  %s4019_s2 = inlined_call_operand.hbm [shape: bf16[128,1024], index: 2, kind: input, shape index: {}]   ;;  %s4020_s3 = inlined_call_operand.vmem [shape: f32[1,1024], index: 3, kind: input, shape index: {}]   ;;  %s4021_s4 = inlined_call_operand.hbm [shape: bf16[1024,512], index: 4, kind: input, shape index: {}]   ;;  %s4022_s5 = inlined_call_operand.vmem [shape: f32[1,512], index: 5, kind: input, shape index: {}]   ;;  %s4023_s6 = inlined_call_operand.hbm [shape: bf16[512,128], index: 6, kind: input, shape index: {}]   ;;  %s4024_s7 = inlined_call_operand.vmem [shape: f32[1,128], index: 7, kind: input, shape index: {}]   ;;  %s4025_s8 = inlined_call_operand.vmem [shape: f32[1,8,128], index: 8, kind: output, shape index: {}]  }
   0x1   :  { %14 = vsyncpa [#allocation5], 0  ;;  %s3847_s27 = smov [#allocation4]   ;;  %s3777_s9 = scalar_lea.hbm %s4021_s4, 32768 }
   0x2   :  { %s38_s28 = sshll.u32 %s3847_s27, 4  ;;  %p3778_p0 = scmp.ne.s32.totalorder %s4021_s4, %s3777_s9  ;;  %s39_s28 = int_to_ptr.vmem [resolvable:$true] %s38_s28 }
   0x3   :  { %p3781_p1 = scmp.lt.u32.totalorder %s3777_s9, %s4021_s4 }
   0x5   :  { %p3783_p2 = pnand %p3781_p1, %p3778_p0 }
   0x7   :  { %3786 = shalt.err (!%p3783_p2)
}
   0x8   :  { %s3787_s14 = scalar_lea.vmem %s39_s28, 32768  ;;  %p3792_p4 = scmp.lt.s32.totalorder %s39_s28, %s39_s28 }
   0x9   :  { %p3788_p3 = scmp.ne.s32.totalorder %s39_s28, %s3787_s14  ;;  %p3793_p5 = scmp.lt.s32.totalorder %s3787_s14, %s3787_s14 }
   0xb   :  { %p3794_p6 = por %p3793_p5, %p3792_p4 }
   0xd   :  { %p3795_p7 = pnand %p3794_p6, %p3788_p3 }
   0xf   :  { %3798 = shalt.err (!%p3795_p7)
}
  0x10   :  { %s3848_s15 = smov 256   ;;  %s3849_s16 = smov 16  }
  0x11   :  { %44 = dma.hbm_to_vmem [thread:$0]  %s4021_s4, 32768, %s39_s28, [#allocation5], %s3848_s15, %s3848_s15, %s3849_s16  }
  0x12   :  { %s3850_s19 = smov [#allocation2]   ;;  %s3799_s23 = scalar_lea.hbm %s4019_s2, 8192 }
  0x13   :  { %s24_s20 = sshll.u32 %s3850_s19, 4  ;;  %p3800_p8 = scmp.ne.s32.totalorder %s4019_s2, %s3799_s23  ;;  %s25_s20 = int_to_ptr.vmem [resolvable:$true] %s24_s20 }
  0x14   :  { %p3803_p9 = scmp.lt.u32.totalorder %s3799_s23, %s4019_s2 }
  0x16   :  { %p3805_p10 = pnand %p3803_p9, %p3800_p8 }
  0x18   :  { %3808 = shalt.err (!%p3805_p10)
}
  0x19   :  { %s3809_s29 = scalar_lea.vmem %s25_s20, 8192  ;;  %p3814_p12 = scmp.lt.s32.totalorder %s25_s20, %s25_s20 }
  0x1a   :  { %p3810_p11 = scmp.ne.s32.totalorder %s25_s20, %s3809_s29  ;;  %p3815_p13 = scmp.lt.s32.totalorder %s3809_s29, %s3809_s29 }
  0x1c   :  { %p3816_p0 = por %p3815_p13, %p3814_p12 }
  0x1e   :  { %p3817_p1 = pnand %p3816_p0, %p3810_p11 }
  0x20   :  { %3820 = shalt.err (!%p3817_p1)
}
  0x21   :  { %s3851_s4 = smov 512   ;;  %s3852_s28 = smov 32  }
  0x22   :  { %30 = dma.hbm_to_vmem [thread:$0]  %s4019_s2, 8192, %s25_s20, [#allocation3], %s3851_s4, %s3851_s4, %s3852_s28  }
  0x23   :  { %s3853_s10 = smov [#allocation6]   ;;  %s3821_s14 = scalar_lea.hbm %s4023_s6, 4096 }
  0x24   :  { %s52_s11 = sshll.u32 %s3853_s10, 4  ;;  %p3822_p2 = scmp.ne.s32.totalorder %s4023_s6, %s3821_s14  ;;  %s53_s11 = int_to_ptr.vmem [resolvable:$true] %s52_s11 }
  0x25   :  { %p3825_p3 = scmp.lt.u32.totalorder %s3821_s14, %s4023_s6 }
  0x27   :  { %p3827_p4 = pnand %p3825_p3, %p3822_p2 }
  0x29   :  { %3830 = shalt.err (!%p3827_p4)
}
  0x2a   :  { %s3831_s19 = scalar_lea.vmem %s53_s11, 4096  ;;  %p3836_p6 = scmp.lt.s32.totalorder %s53_s11, %s53_s11 }
  0x2b   :  { %p3832_p5 = scmp.ne.s32.totalorder %s53_s11, %s3831_s19  ;;  %p3837_p7 = scmp.lt.s32.totalorder %s3831_s19, %s3831_s19 }
  0x2d   :  { %p3838_p8 = por %p3837_p7, %p3836_p6 }
  0x2f   :  { %p3839_p9 = pnand %p3838_p8, %p3832_p5 }
  0x31   :  { %3842 = shalt.err (!%p3839_p9)
}
  0x32   :  { %s3854_s2 = smov 64   ;;  %s3855_s20 = smov 4  }
  0x33   :  { %58 = dma.hbm_to_vmem [thread:$0]  %s4023_s6, 4096, %s53_s11, [#allocation5], %s3854_s2, %s3854_s2, %s3855_s20  }
  0x34   :  { %3843 = dma.done.wait [#allocation3], 8192  }
  0x35   :  { %3844 = vsyncadd [#allocation3], 4294959104 }
  0x36   :  { %3845 = dma.done.wait [#allocation5], 36864  }
  0x37   :  { %3846 = vsyncadd [#allocation5], 4294930432  ;;  %v3856_v0 = vmov 0   ;;  %v71_v1 = vld [vmem:[#allocation2] sm:$0xff]  ;;  %v72_v14 = vld [vmem:[#allocation2 + $0x8] sm:$0xff] }
  0x38   :  { %856 = vmatprep.mubr.bf16.mxu0 %v3856_v0  ;;  %897 = vmatprep.mubr.bf16.mxu1 %v3856_v0  ;;  %v75_v2 = vld [vmem:[#allocation2 + $0x20] sm:$0xff]  ;;  %v76_v15 = vld [vmem:[#allocation2 + $0x28] sm:$0xff]  ;;  %v73_v60 = vld [vmem:[#allocation2 + $0x10] sm:$0xff] }
  0x39   :  { %v79_v3 = vld [vmem:[#allocation2 + $0x40] sm:$0xff]  ;;  %v2927_v4 = vcombine.high %v71_v1, %v75_v2  ;;  %v2926_v5 = vcombine.low %v71_v1, %v75_v2  ;;  %v80_v16 = vld [vmem:[#allocation2 + $0x48] sm:$0xff]  ;;  %v2929_v17 = vcombine.high %v72_v14, %v76_v15  ;;  %v2928_v18 = vcombine.low %v72_v14, %v76_v15  ;;  %v77_v62 = vld [vmem:[#allocation2 + $0x30] sm:$0xff] }
  0x3a   :  { %v83_v6 = vld [vmem:[#allocation2 + $0x60] sm:$0xff]  ;;  %v84_v19 = vld [vmem:[#allocation2 + $0x68] sm:$0xff]  ;;  %v89_v15 = vld [vmem:[#allocation2 + $0x90] sm:$0xff] }
  0x3b   :  { %v2935_v7 = vcombine.high %v79_v3, %v83_v6  ;;  %v87_v8 = vld [vmem:[#allocation2 + $0x80] sm:$0xff]  ;;  %824 = vmatprep.subr.bf16.mxu0 %v2927_v4  ;;  %v2934_v10 = vcombine.low %v79_v3, %v83_v6  ;;  %v2937_v21 = vcombine.high %v80_v16, %v84_v19  ;;  %v88_v22 = vld [vmem:[#allocation2 + $0x88] sm:$0xff]  ;;  %865 = vmatprep.subr.bf16.mxu1 %v2929_v17  ;;  %v81_v6 = vld [vmem:[#allocation2 + $0x50] sm:$0xff] }
  0x3c   :  { %v91_v9 = vld [vmem:[#allocation2 + $0xa0] sm:$0xff]  ;;  %825 = vmatpush1.bf16.msra.mxu0 %v2926_v5  ;;  %v92_v23 = vld [vmem:[#allocation2 + $0xa8] sm:$0xff]  ;;  %866 = vmatpush1.bf16.msra.mxu1 %v2928_v18  ;;  %v2936_v27 = vcombine.low %v80_v16, %v84_v19  ;;  %v2931_v5 = vcombine.high %v73_v60, %v77_v62  ;;  %v93_v17 = vld [vmem:[#allocation2 + $0xb0] sm:$0xff] }
  0x3d   :  { %826 = vmatprep.subr.bf16.mxu0 %v2935_v7  ;;  %v2943_v11 = vcombine.high %v87_v8, %v91_v9  ;;  %v95_v12 = vld [vmem:[#allocation2 + $0xc0] sm:$0xff]  ;;  %v2942_v20 = vcombine.low %v87_v8, %v91_v9  ;;  %867 = vmatprep.subr.bf16.mxu1 %v2937_v21  ;;  %v2945_v28 = vcombine.high %v88_v22, %v92_v23  ;;  %v96_v30 = vld [vmem:[#allocation2 + $0xc8] sm:$0xff]  ;;  %v85_v8 = vld [vmem:[#allocation2 + $0x70] sm:$0xff] }
  0x3e   :  { %v99_v13 = vld [vmem:[#allocation2 + $0xe0] sm:$0xff]  ;;  %v100_v31 = vld [vmem:[#allocation2 + $0xe8] sm:$0xff]  ;;  %v2944_v35 = vcombine.low %v88_v22, %v92_v23  ;;  %v2939_v14 = vcombine.high %v81_v6, %v85_v8  ;;  %v2938_v19 = vcombine.low %v81_v6, %v85_v8  ;;  %v86_v21 = vld [vmem:[#allocation2 + $0x78] sm:$0xff]  ;;  %v2947_v22 = vcombine.high %v89_v15, %v93_v17 }
  0x3f   :  { %v2951_v24 = vcombine.high %v95_v12, %v99_v13  ;;  %v103_v25 = vld [vmem:[#allocation2 + $0x100] sm:$0xff]  ;;  %v2950_v29 = vcombine.low %v95_v12, %v99_v13  ;;  %v2953_v36 = vcombine.high %v96_v30, %v100_v31  ;;  %v104_v38 = vld [vmem:[#allocation2 + $0x108] sm:$0xff]  ;;  %v2952_v43 = vcombine.low %v96_v30, %v100_v31  ;;  %v74_v12 = vld [vmem:[#allocation2 + $0x18] sm:$0xff] }
  0x40   :  { %827 = vmatpush1.bf16.msra.mxu0 %v2934_v10  ;;  %v107_v26 = vld [vmem:[#allocation2 + $0x120] sm:$0xff]  ;;  %868 = vmatpush1.bf16.msra.mxu1 %v2936_v27  ;;  %v108_v39 = vld [vmem:[#allocation2 + $0x128] sm:$0xff]  ;;  %v78_v13 = vld [vmem:[#allocation2 + $0x38] sm:$0xff]  ;;  %v2946_v27 = vcombine.low %v89_v15, %v93_v17 }
  0x41   :  { %828 = vmatprep.subr.bf16.mxu0 %v2943_v11  ;;  %v2959_v32 = vcombine.high %v103_v25, %v107_v26  ;;  %v111_v33 = vld [vmem:[#allocation2 + $0x140] sm:$0xff]  ;;  %869 = vmatprep.subr.bf16.mxu1 %v2945_v28  ;;  %v2958_v37 = vcombine.low %v103_v25, %v107_v26  ;;  %v2961_v44 = vcombine.high %v104_v38, %v108_v39  ;;  %v112_v47 = vld [vmem:[#allocation2 + $0x148] sm:$0xff]  ;;  %v97_v23 = vld [vmem:[#allocation2 + $0xd0] sm:$0xff] }
  0x42   :  { %v115_v34 = vld [vmem:[#allocation2 + $0x160] sm:$0xff]  ;;  %v116_v48 = vld [vmem:[#allocation2 + $0x168] sm:$0xff]  ;;  %v2960_v52 = vcombine.low %v104_v38, %v108_v39  ;;  %v2930_v11 = vcombine.low %v73_v60, %v77_v62  ;;  %v2933_v18 = vcombine.high %v74_v12, %v78_v13  ;;  %v2932_v25 = vcombine.low %v74_v12, %v78_v13  ;;  %v90_v28 = vld [vmem:[#allocation2 + $0x98] sm:$0xff] }
  0x43   :  { %v2967_v40 = vcombine.high %v111_v33, %v115_v34  ;;  %v119_v41 = vld [vmem:[#allocation2 + $0x180] sm:$0xff]  ;;  %v2966_v45 = vcombine.low %v111_v33, %v115_v34  ;;  %v2969_v55 = vcombine.high %v112_v47, %v116_v48  ;;  %v120_v57 = vld [vmem:[#allocation2 + $0x188] sm:$0xff]  ;;  %v2968_v61 = vcombine.low %v112_v47, %v116_v48  ;;  %v105_v31 = vld [vmem:[#allocation2 + $0x110] sm:$0xff] }
  0x44   :  { %829 = vmatpush1.bf16.msra.mxu0 %v2942_v20  ;;  %v123_v42 = vld [vmem:[#allocation2 + $0x1a0] sm:$0xff]  ;;  %870 = vmatpush1.bf16.msra.mxu1 %v2944_v35  ;;  %v124_v58 = vld [vmem:[#allocation2 + $0x1a8] sm:$0xff]  ;;  %v82_v20 = vld [vmem:[#allocation2 + $0x58] sm:$0xff] }
  0x45   :  { %830 = vmatprep.subr.bf16.mxu0 %v2951_v24  ;;  %871 = vmatprep.subr.bf16.mxu1 %v2953_v36  ;;  %v459_v46 = vld [vmem:[%s4017_s0] sm:$0xf]  ;;  %v2975_v49 = vcombine.high %v119_v41, %v123_v42  ;;  %v2974_v56 = vcombine.low %v119_v41, %v123_v42  ;;  %v2977_v1 = vcombine.high %v120_v57, %v124_v58  ;;  %v128_v3 = vld [vmem:[#allocation2 + $0x1c8] sm:$0xff]  ;;  %v101_v24 = vld [vmem:[#allocation2 + $0xf0] sm:$0xff] }
  0x46   :  { %v127_v50 = vld [vmem:[#allocation2 + $0x1c0] sm:$0xff]  ;;  %v460_v54 = vunpack.c.l.bf16 %v459_v46  ;;  %v132_v4 = vld [vmem:[#allocation2 + $0x1e8] sm:$0xff]  ;;  %v2976_v7 = vcombine.low %v120_v57, %v124_v58  ;;  %v2941_v26 = vcombine.high %v82_v20, %v86_v21  ;;  %v2955_v30 = vcombine.high %v97_v23, %v101_v24  ;;  %v98_v36 = vld [vmem:[#allocation2 + $0xd8] sm:$0xff] }
  0x47   :  { %v131_v51 = vld [vmem:[#allocation2 + $0x1e0] sm:$0xff]  ;;  %v2985_v10 = vcombine.high %v128_v3, %v132_v4  ;;  %v2984_v16 = vcombine.low %v128_v3, %v132_v4  ;;  %v2940_v33 = vcombine.low %v82_v20, %v86_v21  ;;  %v2954_v35 = vcombine.low %v97_v23, %v101_v24  ;;  %v113_v39 = vld [vmem:[#allocation2 + $0x150] sm:$0xff]  ;;  %v126_v60 = vld [vmem:[#allocation2 + $0x1b8] sm:$0xff] }
  0x48   :  { %831 = vmatpush1.bf16.msra.mxu0 %v2950_v29  ;;  %872 = vmatpush1.bf16.msra.mxu1 %v2952_v43  ;;  %v458_v53 = vld [vmem:[%s4018_s1] sm:$0xff]  ;;  %v2983_v59 = vcombine.high %v127_v50, %v131_v51  ;;  %v2982_v2 = vcombine.low %v127_v50, %v131_v51  ;;  %v94_v29 = vld [vmem:[#allocation2 + $0xb8] sm:$0xff]  ;;  %v121_v46 = vld [vmem:[#allocation2 + $0x190] sm:$0xff] }
  0x49   :  { %832 = vmatprep.subr.bf16.mxu0 %v2959_v32  ;;  %873 = vmatprep.subr.bf16.mxu1 %v2961_v44  ;;  %v461_v63 = vadd.f32 %v460_v54, %v458_v53  ;;  %v109_v32 = vld [vmem:[#allocation2 + $0x130] sm:$0xff]  ;;  %v2949_v34 = vcombine.high %v90_v28, %v94_v29  ;;  %v2948_v41 = vcombine.low %v90_v28, %v94_v29  ;;  %v106_v44 = vld [vmem:[#allocation2 + $0x118] sm:$0xff] }
  0x4a   :  { %v2963_v38 = vcombine.high %v105_v31, %v109_v32  ;;  %v2962_v43 = vcombine.low %v105_v31, %v109_v32  ;;  %v125_v47 = vld [vmem:[#allocation2 + $0x1b0] sm:$0xff]  ;;  %v114_v51 = vld [vmem:[#allocation2 + $0x158] sm:$0xff] }
  0x4b   :  { %v3946_v9 = vpack.c.bf16 %v461_v63, %v461_v63  ;;  %v2979_v53 = vcombine.high %v121_v46, %v125_v47  ;;  %v129_v54 = vld [vmem:[#allocation2 + $0x1d0] sm:$0xff]  ;;  %v2978_v58 = vcombine.low %v121_v46, %v125_v47  ;;  %v130_v63 = vld [vmem:[#allocation2 + $0x1d8] sm:$0xff] }
  0x4c   :  { %833 = vmatpush1.bf16.msra.mxu0 %v2958_v37  ;;  %874 = vmatpush1.bf16.msra.mxu1 %v2960_v52  ;;  %v102_v37 = vld [vmem:[#allocation2 + $0xf8] sm:$0xff]  ;;  %v3363_v3 = vld [vmem:[#allocation4 + $0x4] ss:$16 sps:$4 sm:$0xff]   ;;  %v3361_v6 = vld [vmem:[#allocation4] ss:$16 sps:$4 sm:$0xff]  }
  0x4d   :  { %834 = vmatprep.subr.bf16.mxu0 %v2967_v40  ;;  %875 = vmatprep.subr.bf16.mxu1 %v2969_v55  ;;  %v117_v40 = vld [vmem:[#allocation2 + $0x170] sm:$0xff]  ;;  %v2957_v42 = vcombine.high %v98_v36, %v102_v37  ;;  %v2956_v48 = vcombine.low %v98_v36, %v102_v37  ;;  %v118_v52 = vld [vmem:[#allocation2 + $0x178] sm:$0xff] }
  0x4e   :  { %v2970_v50 = vcombine.low %v113_v39, %v117_v40  ;;  %v133_v55 = vld [vmem:[#allocation2 + $0x1f0] sm:$0xff]  ;;  %v2973_v57 = vcombine.high %v114_v51, %v118_v52  ;;  %v2972_v62 = vcombine.low %v114_v51, %v118_v52  ;;  %v3372_v15 = vld [vmem:[#allocation4 + $0x2c] ss:$16 sps:$4 sm:$0xff]   ;;  %v3388_v29 = vld [vmem:[#allocation4 + $0x88] ss:$16 sps:$4 sm:$0xff]  }
  0x4f   :  { %v2986_v4 = vcombine.low %v129_v54, %v133_v55  ;;  %v3369_v8 = vld [vmem:[#allocation4 + $0x24] ss:$16 sps:$4 sm:$0xff]   ;;  %v3367_v12 = vld [vmem:[#allocation4 + $0x20] ss:$16 sps:$4 sm:$0xff]   ;;  %v3384_v23 = vld [vmem:[#allocation4 + $0x6c] ss:$16 sps:$4 sm:$0xff]  }
  0x50   :  { %835 = vmatpush1.bf16.msra.mxu0 %v2966_v45  ;;  %876 = vmatpush1.bf16.msra.mxu1 %v2968_v61  ;;  %v110_v45 = vld [vmem:[#allocation2 + $0x138] sm:$0xff]  ;;  %v2987_v61 = vcombine.high %v129_v54, %v133_v55  ;;  %v3375_v13 = vld [vmem:[#allocation4 + $0x44] ss:$16 sps:$4 sm:$0xff]   ;;  %v3379_v20 = vld [vmem:[#allocation4 + $0x60] ss:$16 sps:$4 sm:$0xff]  }
  0x51   :  { %836 = vmatprep.subr.bf16.mxu0 %v2975_v49  ;;  %877 = vmatprep.subr.bf16.mxu1 %v2977_v1  ;;  %v2965_v49 = vcombine.high %v106_v44, %v110_v45  ;;  %v3381_v17 = vld [vmem:[#allocation4 + $0x64] ss:$16 sps:$4 sm:$0xff]   ;;  %v3385_v24 = vld [vmem:[#allocation4 + $0x80] ss:$16 sps:$4 sm:$0xff]   ;;  %v3400_v37 = vld [vmem:[#allocation4 + $0xc8] ss:$16 sps:$4 sm:$0xff]  }
  0x52   :  { %v3387_v21 = vld [vmem:[#allocation4 + $0x84] ss:$16 sps:$4 sm:$0xff]   ;;  %v3397_v31 = vld [vmem:[#allocation4 + $0xc0] ss:$16 sps:$4 sm:$0xff]   ;;  %v3424_v52 = vld [vmem:[#allocation4 + $0x148] ss:$16 sps:$4 sm:$0xff]  }
  0x53   :  { %v3399_v28 = vld [vmem:[#allocation4 + $0xc4] ss:$16 sps:$4 sm:$0xff]   ;;  %v3421_v46 = vld [vmem:[#allocation4 + $0x140] ss:$16 sps:$4 sm:$0xff]  }
  0x54   :  { %837 = vmatpush1.bf16.msra.mxu0 %v2974_v56  ;;  %878 = vmatpush1.bf16.msra.mxu1 %v2976_v7  ;;  %v2964_v56 = vcombine.low %v106_v44, %v110_v45  ;;  %v3405_v32 = vld [vmem:[#allocation4 + $0xe4] ss:$16 sps:$4 sm:$0xff]   ;;  %v3412_v45 = vld [vmem:[#allocation4 + $0x108] ss:$16 sps:$4 sm:$0xff]   ;;  %v3433_v54 = vld [vmem:[#allocation4 + $0x180] ss:$16 sps:$4 sm:$0xff]  }
  0x55   :  { %838 = vmatprep.subr.bf16.mxu0 %v2983_v59  ;;  %879 = vmatprep.subr.bf16.mxu1 %v2985_v10  ;;  %v122_v59 = vld [vmem:[#allocation2 + $0x198] sm:$0xff]  ;;  %v3411_v36 = vld [vmem:[#allocation4 + $0x104] ss:$16 sps:$4 sm:$0xff]  }
  0x56   :  { %v2981_v1 = vcombine.high %v122_v59, %v126_v60  ;;  %v3366_v10 = vld [vmem:[#allocation4 + $0xc] ss:$16 sps:$4 sm:$0xff]   ;;  %v3423_v44 = vld [vmem:[#allocation4 + $0x144] ss:$16 sps:$4 sm:$0xff]  }
  0x57   :  { %v3429_v47 = vld [vmem:[#allocation4 + $0x164] ss:$16 sps:$4 sm:$0xff]  }
  0x58   :  { %839 = vmatpush1.bf16.msra.mxu0 %v2982_v2  ;;  %880 = vmatpush1.bf16.msra.mxu1 %v2984_v16  ;;  %v134_v2 = vld [vmem:[#allocation2 + $0x1f8] sm:$0xff]  ;;  %v3373_v16 = vld [vmem:[#allocation4 + $0x40] ss:$16 sps:$4 sm:$0xff]   ;;  %v3435_v51 = vld [vmem:[#allocation4 + $0x184] ss:$16 sps:$4 sm:$0xff]  }
  0x59   :  { %906 = vmatprep.subr.bf16.mxu0 %v2931_v5  ;;  %947 = vmatprep.subr.bf16.mxu1 %v2933_v18  ;;  %v2980_v5 = vcombine.low %v122_v59, %v126_v60  ;;  %v2989_v7 = vcombine.high %v130_v63, %v134_v2  ;;  %v3370_v18 = vld [vmem:[#allocation4 + $0x28] ss:$16 sps:$4 sm:$0xff]   ;;  %v3441_v55 = vld [vmem:[#allocation4 + $0x1a4] ss:$16 sps:$4 sm:$0xff]   ;;  %v3439_v59 = vld [vmem:[#allocation4 + $0x1a0] ss:$16 sps:$4 sm:$0xff]  }
  0x5a   :  { %v3444_v60 = vld [vmem:[#allocation4 + $0x1ac] ss:$16 sps:$4 sm:$0xff]  }
  0x5b   :  { %857 = vmatmul.mubr.bf16.vlgmr.msra.gmra.mrb[0].mxu0 %v3946_v9  ;;  %898 = vmatmul.mubr.bf16.vlgmr.msra.gmra.mrb[0].mxu1 %v3946_v9 }
  0x5c   :  { %907 = vmatpush1.bf16.msra.mxu0 %v2930_v11  ;;  %938 = vmatprep.mubr.bf16.mxu0 %v3856_v0  ;;  %v2988_v11 = vcombine.low %v130_v63, %v134_v2  ;;  %v3445_v63 = vld [vmem:[#allocation4 + $0x1c0] ss:$16 sps:$4 sm:$0xff]   ;;  %v3453_v2 = vld [vmem:[#allocation4 + $0x1e4] ss:$16 sps:$4 sm:$0xff]  }
  0x5d   :  { %908 = vmatprep.subr.bf16.mxu0 %v2939_v14  ;;  %948 = vmatpush1.bf16.msra.mxu1 %v2932_v25  ;;  %v3364_v14 = vld [vmem:[#allocation4 + $0x8] ss:$16 sps:$4 sm:$0xff]   ;;  %v3393_v25 = vld [vmem:[#allocation4 + $0xa4] ss:$16 sps:$4 sm:$0xff]  }
  0x5e   :  { %979 = vmatprep.mubr.bf16.mxu1 %v3856_v0  ;;  %949 = vmatprep.subr.bf16.mxu1 %v2941_v26  ;;  %v2971_v0 = vcombine.high %v113_v39, %v117_v40  ;;  %v3382_v26 = vld [vmem:[#allocation4 + $0x68] ss:$16 sps:$4 sm:$0xff]   ;;  %v3409_v39 = vld [vmem:[#allocation4 + $0x100] ss:$16 sps:$4 sm:$0xff]   ;;  %v3417_v40 = vld [vmem:[#allocation4 + $0x124] ss:$16 sps:$4 sm:$0xff]  }
  0x60   :  { %909 = vmatpush1.bf16.msra.mxu0 %v2938_v19  ;;  %v3378_v19 = vld [vmem:[#allocation4 + $0x4c] ss:$16 sps:$4 sm:$0xff]  }
  0x61   :  { %910 = vmatprep.subr.bf16.mxu0 %v2947_v22  ;;  %950 = vmatpush1.bf16.msra.mxu1 %v2940_v33  ;;  %v3376_v22 = vld [vmem:[#allocation4 + $0x48] ss:$16 sps:$4 sm:$0xff]  }
  0x62   :  { %951 = vmatprep.subr.bf16.mxu1 %v2949_v34  ;;  %v3394_v33 = vld [vmem:[#allocation4 + $0xa8] ss:$16 sps:$4 sm:$0xff]   ;;  %v3402_v34 = vld [vmem:[#allocation4 + $0xcc] ss:$16 sps:$4 sm:$0xff]  }
  0x64   :  { %911 = vmatpush1.bf16.msra.mxu0 %v2946_v27  ;;  %v3390_v27 = vld [vmem:[#allocation4 + $0x8c] ss:$16 sps:$4 sm:$0xff]  }
  0x65   :  { %912 = vmatprep.subr.bf16.mxu0 %v2955_v30  ;;  %952 = vmatpush1.bf16.msra.mxu1 %v2948_v41  ;;  %v3396_v30 = vld [vmem:[#allocation4 + $0xac] ss:$16 sps:$4 sm:$0xff]   ;;  %v3406_v41 = vld [vmem:[#allocation4 + $0xe8] ss:$16 sps:$4 sm:$0xff]  }
  0x66   :  { %953 = vmatprep.subr.bf16.mxu1 %v2957_v42  ;;  %v3414_v42 = vld [vmem:[#allocation4 + $0x10c] ss:$16 sps:$4 sm:$0xff]  }
  0x68   :  { %913 = vmatpush1.bf16.msra.mxu0 %v2954_v35  ;;  %v3403_v35 = vld [vmem:[#allocation4 + $0xe0] ss:$16 sps:$4 sm:$0xff]  }
  0x69   :  { %914 = vmatprep.subr.bf16.mxu0 %v2963_v38  ;;  %954 = vmatpush1.bf16.msra.mxu1 %v2956_v48  ;;  %v3408_v38 = vld [vmem:[#allocation4 + $0xec] ss:$16 sps:$4 sm:$0xff]   ;;  %v3418_v48 = vld [vmem:[#allocation4 + $0x128] ss:$16 sps:$4 sm:$0xff]  }
  0x6a   :  { %955 = vmatprep.subr.bf16.mxu1 %v2965_v49  ;;  %v3426_v49 = vld [vmem:[#allocation4 + $0x14c] ss:$16 sps:$4 sm:$0xff]  }
  0x6c   :  { %915 = vmatpush1.bf16.msra.mxu0 %v2962_v43  ;;  %v3415_v43 = vld [vmem:[#allocation4 + $0x120] ss:$16 sps:$4 sm:$0xff]  }
  0x6d   :  { %916 = vmatprep.subr.bf16.mxu0 %v2971_v0  ;;  %956 = vmatpush1.bf16.msra.mxu1 %v2964_v56  ;;  %v3420_v0 = vld [vmem:[#allocation4 + $0x12c] ss:$16 sps:$4 sm:$0xff]   ;;  %v3430_v56 = vld [vmem:[#allocation4 + $0x168] ss:$16 sps:$4 sm:$0xff]  }
  0x6e   :  { %957 = vmatprep.subr.bf16.mxu1 %v2973_v57  ;;  %v3438_v57 = vld [vmem:[#allocation4 + $0x18c] ss:$16 sps:$4 sm:$0xff]  }
  0x70   :  { %917 = vmatpush1.bf16.msra.mxu0 %v2970_v50  ;;  %v3427_v50 = vld [vmem:[#allocation4 + $0x160] ss:$16 sps:$4 sm:$0xff]  }
  0x71   :  { %918 = vmatprep.subr.bf16.mxu0 %v2979_v53  ;;  %958 = vmatpush1.bf16.msra.mxu1 %v2972_v62  ;;  %v3432_v53 = vld [vmem:[#allocation4 + $0x16c] ss:$16 sps:$4 sm:$0xff]   ;;  %v3442_v62 = vld [vmem:[#allocation4 + $0x1a8] ss:$16 sps:$4 sm:$0xff]  }
  0x72   :  { %959 = vmatprep.subr.bf16.mxu1 %v2981_v1  ;;  %v3450_v1 = vld [vmem:[#allocation4 + $0x1cc] ss:$16 sps:$4 sm:$0xff]  }
  0x74   :  { %919 = vmatpush1.bf16.msra.mxu0 %v2978_v58  ;;  %v3436_v58 = vld [vmem:[#allocation4 + $0x188] ss:$16 sps:$4 sm:$0xff]  }
  0x75   :  { %920 = vmatprep.subr.bf16.mxu0 %v2987_v61  ;;  %960 = vmatpush1.bf16.msra.mxu1 %v2980_v5  ;;  %v3447_v61 = vld [vmem:[#allocation4 + $0x1c4] ss:$16 sps:$4 sm:$0xff]   ;;  %v3456_v5 = vld [vmem:[#allocation4 + $0x1ec] ss:$16 sps:$4 sm:$0xff]  }
  0x76   :  { %961 = vmatprep.subr.bf16.mxu1 %v2989_v7  ;;  %v3454_v7 = vld [vmem:[#allocation4 + $0x1e8] ss:$16 sps:$4 sm:$0xff]  }
  0x78   :  { %921 = vmatpush1.bf16.msra.mxu0 %v2986_v4  ;;  %v3451_v4 = vld [vmem:[#allocation4 + $0x1e0] ss:$16 sps:$4 sm:$0xff]  }
  0x79   :  { %2305 = vmatprep.subr.bf16.mxu0 %v3363_v3  ;;  %962 = vmatpush1.bf16.msra.mxu1 %v2988_v11  ;;  %v3448_v3 = vld [vmem:[#allocation4 + $0x1c8] ss:$16 sps:$4 sm:$0xff]  }
  0x7a   :  { %2469 = vmatprep.subr.bf16.mxu1 %v3366_v10  ;;  %v464_v10 = vlaneseq }
  0x7b   :  { %939 = vmatmul.mubr.bf16.vlgmr.msra.gmra.mrb[4].mxu0 %v3946_v9 }
  0x7c   :  { %2306 = vmatpush1.bf16.msra.mxu0 %v3361_v6  ;;  %980 = vmatmul.mubr.bf16.vlgmr.msra.gmra.mrb[4].mxu1 %v3946_v9  ;;  %v3391_v9 = vld [vmem:[#allocation4 + $0xa0] ss:$16 sps:$4 sm:$0xff]   ;;  %v3459_v6 = vld [vmem:[#allocation4 + $0x204] ss:$16 sps:$4 sm:$0xff]   ;;  %v3954_v11 = vshrl.u32 %v464_v10, 7 }
  0x7d   :  { %2307 = vmatprep.subr.bf16.mxu0 %v3369_v8  ;;  %2470 = vmatpush1.bf16.msra.mxu1 %v3364_v14  ;;  %v3462_v8 = vld [vmem:[#allocation4 + $0x20c] ss:$16 sps:$4 sm:$0xff]  }
  0x7e   :  { %2471 = vmatprep.subr.bf16.mxu1 %v3372_v15  ;;  %v470_v14 = vsub.s32 1, %v3954_v11 }
  0x80   :  { %2308 = vmatpush1.bf16.msra.mxu0 %v3367_v12  ;;  %v466_v12 = vsub.s32 0, %v3954_v11 }
  0x81   :  { %2309 = vmatprep.subr.bf16.mxu0 %v3375_v13  ;;  %2472 = vmatpush1.bf16.msra.mxu1 %v3370_v18  ;;  %v3960_v13 = vld [vmem:[%s4020_s3] sm:$0xff]  ;;  %v478_v18 = vsub.s32 3, %v3954_v11 }
  0x82   :  { %2473 = vmatprep.subr.bf16.mxu1 %v3378_v19  ;;  %v467_v15 = vrot.slane %v3960_v13, %v466_v12 }
  0x84   :  { %2310 = vmatpush1.bf16.msra.mxu0 %v3373_v16  ;;  %v471_v16 = vrot.slane %v3960_v13, %v470_v14 }
  0x85   :  { %2311 = vmatprep.subr.bf16.mxu0 %v3381_v17  ;;  %2474 = vmatpush1.bf16.msra.mxu1 %v3376_v22 }
  0x86   :  { %2475 = vmatprep.subr.bf16.mxu1 %v3384_v23 }
  0x88   :  { %2312 = vmatpush1.bf16.msra.mxu0 %v3379_v20 }
  0x89   :  { %2313 = vmatprep.subr.bf16.mxu0 %v3387_v21  ;;  %2476 = vmatpush1.bf16.msra.mxu1 %v3382_v26  ;;  %v479_v26 = vrot.slane %v3960_v13, %v478_v18 }
  0x8a   :  { %2477 = vmatprep.subr.bf16.mxu1 %v3390_v27 }
  0x8c   :  { %2314 = vmatpush1.bf16.msra.mxu0 %v3385_v24 }
  0x8d   :  { %2315 = vmatprep.subr.bf16.mxu0 %v3393_v25  ;;  %2478 = vmatpush1.bf16.msra.mxu1 %v3388_v29 }
  0x8e   :  { %2479 = vmatprep.subr.bf16.mxu1 %v3396_v30 }
  0x90   :  { %2316 = vmatpush1.bf16.msra.mxu0 %v3391_v9  ;;  %v3457_v9 = vld [vmem:[#allocation4 + $0x200] ss:$16 sps:$4 sm:$0xff]  }
  0x91   :  { %2317 = vmatprep.subr.bf16.mxu0 %v3399_v28  ;;  %2480 = vmatpush1.bf16.msra.mxu1 %v3394_v33  ;;  %v3460_v28 = vld [vmem:[#allocation4 + $0x208] ss:$16 sps:$4 sm:$0xff]  }
  0x92   :  { %2481 = vmatprep.subr.bf16.mxu1 %v3402_v34 }
  0x94   :  { %2318 = vmatpush1.bf16.msra.mxu0 %v3397_v31  ;;  %v3465_v31 = vld [vmem:[#allocation4 + $0x224] ss:$16 sps:$4 sm:$0xff]  }
  0x95   :  { %2319 = vmatprep.subr.bf16.mxu0 %v3405_v32  ;;  %2482 = vmatpush1.bf16.msra.mxu1 %v3400_v37  ;;  %v3468_v32 = vld [vmem:[#allocation4 + $0x22c] ss:$16 sps:$4 sm:$0xff]   ;;  %v3463_v37 = vld [vmem:[#allocation4 + $0x220] ss:$16 sps:$4 sm:$0xff]  }
  0x96   :  { %2483 = vmatprep.subr.bf16.mxu1 %v3408_v38  ;;  %v3466_v38 = vld [vmem:[#allocation4 + $0x228] ss:$16 sps:$4 sm:$0xff]  }
  0x98   :  { %2320 = vmatpush1.bf16.msra.mxu0 %v3403_v35 }
  0x99   :  { %2321 = vmatprep.subr.bf16.mxu0 %v3411_v36  ;;  %2484 = vmatpush1.bf16.msra.mxu1 %v3406_v41  ;;  %v3474_v41 = vld [vmem:[#allocation4 + $0x24c] ss:$16 sps:$4 sm:$0xff]  }
  0x9a   :  { %2485 = vmatprep.subr.bf16.mxu1 %v3414_v42 }
  0x9c   :  { %2322 = vmatpush1.bf16.msra.mxu0 %v3409_v39 }
  0x9d   :  { %2323 = vmatprep.subr.bf16.mxu0 %v3417_v40  ;;  %2486 = vmatpush1.bf16.msra.mxu1 %v3412_v45  ;;  %v3471_v40 = vld [vmem:[#allocation4 + $0x244] ss:$16 sps:$4 sm:$0xff]  }
  0x9e   :  { %2487 = vmatprep.subr.bf16.mxu1 %v3420_v0  ;;  %v3477_v45 = vld [vmem:[#allocation4 + $0x264] ss:$16 sps:$4 sm:$0xff]   ;;  %v3480_v0 = vld [vmem:[#allocation4 + $0x26c] ss:$16 sps:$4 sm:$0xff]  }
  0xa0   :  { %2324 = vmatpush1.bf16.msra.mxu0 %v3415_v43  ;;  %v3469_v43 = vld [vmem:[#allocation4 + $0x240] ss:$16 sps:$4 sm:$0xff]  }
  0xa1   :  { %2325 = vmatprep.subr.bf16.mxu0 %v3423_v44  ;;  %2488 = vmatpush1.bf16.msra.mxu1 %v3418_v48  ;;  %v3472_v44 = vld [vmem:[#allocation4 + $0x248] ss:$16 sps:$4 sm:$0xff]   ;;  %v3483_v48 = vld [vmem:[#allocation4 + $0x284] ss:$16 sps:$4 sm:$0xff]  }
  0xa2   :  { %2489 = vmatprep.subr.bf16.mxu1 %v3426_v49  ;;  %v3486_v49 = vld [vmem:[#allocation4 + $0x28c] ss:$16 sps:$4 sm:$0xff]  }
  0xa4   :  { %2326 = vmatpush1.bf16.msra.mxu0 %v3421_v46  ;;  %v3475_v46 = vld [vmem:[#allocation4 + $0x260] ss:$16 sps:$4 sm:$0xff]  }
  0xa5   :  { %2327 = vmatprep.subr.bf16.mxu0 %v3429_v47  ;;  %2490 = vmatpush1.bf16.msra.mxu1 %v3424_v52  ;;  %v3478_v47 = vld [vmem:[#allocation4 + $0x268] ss:$16 sps:$4 sm:$0xff]   ;;  %v3489_v52 = vld [vmem:[#allocation4 + $0x2a4] ss:$16 sps:$4 sm:$0xff]  }
  0xa6   :  { %2491 = vmatprep.subr.bf16.mxu1 %v3432_v53  ;;  %v3492_v53 = vld [vmem:[#allocation4 + $0x2ac] ss:$16 sps:$4 sm:$0xff]  }
  0xa8   :  { %2328 = vmatpush1.bf16.msra.mxu0 %v3427_v50  ;;  %v3481_v50 = vld [vmem:[#allocation4 + $0x280] ss:$16 sps:$4 sm:$0xff]  }
  0xa9   :  { %2329 = vmatprep.subr.bf16.mxu0 %v3435_v51  ;;  %2492 = vmatpush1.bf16.msra.mxu1 %v3430_v56  ;;  %v3484_v51 = vld [vmem:[#allocation4 + $0x288] ss:$16 sps:$4 sm:$0xff]   ;;  %v3495_v56 = vld [vmem:[#allocation4 + $0x2c4] ss:$16 sps:$4 sm:$0xff]  }
  0xaa   :  { %2493 = vmatprep.subr.bf16.mxu1 %v3438_v57  ;;  %v3498_v57 = vld [vmem:[#allocation4 + $0x2cc] ss:$16 sps:$4 sm:$0xff]  }
  0xac   :  { %2330 = vmatpush1.bf16.msra.mxu0 %v3433_v54  ;;  %v3487_v54 = vld [vmem:[#allocation4 + $0x2a0] ss:$16 sps:$4 sm:$0xff]  }
  0xad   :  { %2331 = vmatprep.subr.bf16.mxu0 %v3441_v55  ;;  %2494 = vmatpush1.bf16.msra.mxu1 %v3436_v58  ;;  %v3490_v55 = vld [vmem:[#allocation4 + $0x2a8] ss:$16 sps:$4 sm:$0xff]   ;;  %v3493_v58 = vld [vmem:[#allocation4 + $0x2c0] ss:$16 sps:$4 sm:$0xff]  }
  0xae   :  { %2495 = vmatprep.subr.bf16.mxu1 %v3444_v60  ;;  %v3501_v60 = vld [vmem:[#allocation4 + $0x2e4] ss:$16 sps:$4 sm:$0xff]  }
  0xb0   :  { %2332 = vmatpush1.bf16.msra.mxu0 %v3439_v59  ;;  %v3496_v59 = vld [vmem:[#allocation4 + $0x2c8] ss:$16 sps:$4 sm:$0xff]  }
  0xb1   :  { %2333 = vmatprep.subr.bf16.mxu0 %v3447_v61  ;;  %2496 = vmatpush1.bf16.msra.mxu1 %v3442_v62  ;;  %v3504_v61 = vld [vmem:[#allocation4 + $0x2ec] ss:$16 sps:$4 sm:$0xff]  }
  0xb2   :  { %2497 = vmatprep.subr.bf16.mxu1 %v3450_v1  ;;  %v3499_v1 = vld [vmem:[#allocation4 + $0x2e0] ss:$16 sps:$4 sm:$0xff]  }
  0xb4   :  { %2334 = vmatpush1.bf16.msra.mxu0 %v3445_v63 }
  0xb5   :  { %2335 = vmatprep.subr.bf16.mxu0 %v3453_v2  ;;  %2498 = vmatpush1.bf16.msra.mxu1 %v3448_v3  ;;  %v3502_v2 = vld [vmem:[#allocation4 + $0x2e8] ss:$16 sps:$4 sm:$0xff]  }
  0xb6   :  { %2499 = vmatprep.subr.bf16.mxu1 %v3456_v5  ;;  %v3510_v5 = vld [vmem:[#allocation4 + $0x30c] ss:$16 sps:$4 sm:$0xff]  }
  0xb8   :  { %2336 = vmatpush1.bf16.msra.mxu0 %v3451_v4  ;;  %v3507_v4 = vld [vmem:[#allocation4 + $0x304] ss:$16 sps:$4 sm:$0xff]  }
  0xb9   :  { %2346 = vmatprep.subr.bf16.mxu0 %v3459_v6  ;;  %2500 = vmatpush1.bf16.msra.mxu1 %v3454_v7  ;;  %v3505_v7 = vld [vmem:[#allocation4 + $0x300] ss:$16 sps:$4 sm:$0xff]  }
  0xba   :  { %2510 = vmatprep.subr.bf16.mxu1 %v3462_v8  ;;  %v3508_v8 = vld [vmem:[#allocation4 + $0x308] ss:$16 sps:$4 sm:$0xff]  }
 0x12e   :  { %v858_v17 = vpop.f32.mrb[0].mxu0  ;;  %v3973_v29 = vpop.f32.mrb[0].mxu1 }
 0x12f   :  { %v859_v19 = vadd.f32 %v858_v17, %v467_v15  ;;  %v860_v20 = vpop.f32.mrb[1].mxu0  ;;  %v901_v33 = vpop.f32.mrb[1].mxu1  ;;  %v3513_v15 = vld [vmem:[#allocation4 + $0x324] ss:$16 sps:$4 sm:$0xff]  }
 0x130   :  { %v861_v21 = vadd.f32 %v860_v20, %v471_v16  ;;  %v862_v22 = vpop.f32.mrb[2].mxu0  ;;  %v902_v34 = vadd.f32 %v901_v33, %v479_v26  ;;  %v903_v35 = vpop.f32.mrb[2].mxu1  ;;  %v3516_v16 = vld [vmem:[#allocation4 + $0x32c] ss:$16 sps:$4 sm:$0xff]   ;;  %v3520_v26 = vld [vmem:[#allocation4 + $0x348] ss:$16 sps:$4 sm:$0xff]  }
 0x131   :  { %v988_v23 = vmax.f32 %v859_v19, 0.0  ;;  %v863_v24 = vpop.f32.mrb[3].mxu0  ;;  %v904_v36 = vpop.f32.mrb[3].mxu1  ;;  %v3514_v22 = vld [vmem:[#allocation4 + $0x328] ss:$16 sps:$4 sm:$0xff]   ;;  %v474_v33 = vsub.s32 2, %v3954_v11 }
 0x132   :  { %v989_v25 = vmax.f32 %v861_v21, 0.0  ;;  %v991_v39 = vmax.f32 %v902_v34, 0.0  ;;  %v3511_v21 = vld [vmem:[#allocation4 + $0x320] ss:$16 sps:$4 sm:$0xff]   ;;  %v3522_v24 = vld [vmem:[#allocation4 + $0x34c] ss:$16 sps:$4 sm:$0xff]  }
 0x133   :  { %v996_v30 = vpack.c.bf16 %v988_v23, %v988_v23  ;;  %v3519_v23 = vld [vmem:[#allocation4 + $0x344] ss:$16 sps:$4 sm:$0xff]   ;;  %v3529_v34 = vld [vmem:[#allocation4 + $0x380] ss:$16 sps:$4 sm:$0xff]   ;;  %v3532_v35 = vld [vmem:[#allocation4 + $0x388] ss:$16 sps:$4 sm:$0xff]  }
 0x134   :  { %v997_v27 = vpack.c.bf16 %v989_v25, %v989_v25  ;;  %v999_v42 = vpack.c.bf16 %v991_v39, %v991_v39  ;;  %v3517_v25 = vld [vmem:[#allocation4 + $0x340] ss:$16 sps:$4 sm:$0xff]   ;;  %v3537_v36 = vld [vmem:[#allocation4 + $0x3a4] ss:$16 sps:$4 sm:$0xff]   ;;  %v475_v39 = vrot.slane %v3960_v13, %v474_v33 }
 0x136   :  { %2337 = vmatprep.mubr.bf16.mxu0 %v997_v27  ;;  %2501 = vmatprep.mubr.bf16.mxu1 %v997_v27  ;;  %v3525_v27 = vld [vmem:[#allocation4 + $0x364] ss:$16 sps:$4 sm:$0xff]  }
 0x137   :  { %2338 = vmatmul.mubr.bf16.vlgmr.msra.gmra.mrb[8].mxu0 %v996_v30  ;;  %2502 = vmatmul.mubr.bf16.vlgmr.msra.gmra.mrb[8].mxu1 %v996_v30  ;;  %v3526_v30 = vld [vmem:[#allocation4 + $0x368] ss:$16 sps:$4 sm:$0xff]  }
 0x138   :  { %2347 = vmatpush1.bf16.msra.mxu0 %v3457_v9  ;;  %2511 = vmatpush1.bf16.msra.mxu1 %v3460_v28  ;;  %v3528_v9 = vld [vmem:[#allocation4 + $0x36c] ss:$16 sps:$4 sm:$0xff]   ;;  %v3523_v28 = vld [vmem:[#allocation4 + $0x360] ss:$16 sps:$4 sm:$0xff]  }
 0x139   :  { %2348 = vmatprep.subr.bf16.mxu0 %v3465_v31  ;;  %2512 = vmatprep.subr.bf16.mxu1 %v3468_v32  ;;  %v3531_v31 = vld [vmem:[#allocation4 + $0x384] ss:$16 sps:$4 sm:$0xff]   ;;  %v3534_v32 = vld [vmem:[#allocation4 + $0x38c] ss:$16 sps:$4 sm:$0xff]  }
 0x13a   :  { %2378 = vmatprep.mubr.bf16.mxu0 %v999_v42  ;;  %2542 = vmatprep.mubr.bf16.mxu1 %v999_v42  ;;  %v3543_v42 = vld [vmem:[#allocation4 + $0x3c4] ss:$16 sps:$4 sm:$0xff]  }
 0x13c   :  { %2349 = vmatpush1.bf16.msra.mxu0 %v3463_v37  ;;  %2513 = vmatpush1.bf16.msra.mxu1 %v3466_v38  ;;  %v3540_v37 = vld [vmem:[#allocation4 + $0x3ac] ss:$16 sps:$4 sm:$0xff]   ;;  %v486_v38 = vsub.s32 5, %v3954_v11 }
 0x13d   :  { %2350 = vmatprep.subr.bf16.mxu0 %v3471_v40  ;;  %2514 = vmatprep.subr.bf16.mxu1 %v3474_v41  ;;  %v3535_v40 = vld [vmem:[#allocation4 + $0x3a0] ss:$16 sps:$4 sm:$0xff]   ;;  %v3538_v41 = vld [vmem:[#allocation4 + $0x3a8] ss:$16 sps:$4 sm:$0xff]  }
 0x140   :  { %2351 = vmatpush1.bf16.msra.mxu0 %v3469_v43  ;;  %2515 = vmatpush1.bf16.msra.mxu1 %v3472_v44  ;;  %v3546_v43 = vld [vmem:[#allocation4 + $0x3cc] ss:$16 sps:$4 sm:$0xff]   ;;  %v487_v44 = vrot.slane %v3960_v13, %v486_v38  ;;  %v3609_v38 = vld [vmem:[#allocation4 + $0x524] ss:$16 sps:$4 sm:$0xff]  }
 0x141   :  { %2352 = vmatprep.subr.bf16.mxu0 %v3477_v45  ;;  %2516 = vmatprep.subr.bf16.mxu1 %v3480_v0  ;;  %v900_v45 = vadd.f32 %v3973_v29, %v475_v39  ;;  %v3541_v0 = vld [vmem:[#allocation4 + $0x3c0] ss:$16 sps:$4 sm:$0xff]   ;;  %v3612_v39 = vld [vmem:[#allocation4 + $0x52c] ss:$16 sps:$4 sm:$0xff]  }
 0x144   :  { %2353 = vmatpush1.bf16.msra.mxu0 %v3475_v46  ;;  %2517 = vmatpush1.bf16.msra.mxu1 %v3478_v47  ;;  %v3544_v46 = vld [vmem:[#allocation4 + $0x3c8] ss:$16 sps:$4 sm:$0xff]   ;;  %v3549_v47 = vld [vmem:[#allocation4 + $0x3e4] ss:$16 sps:$4 sm:$0xff]  }
 0x145   :  { %2354 = vmatprep.subr.bf16.mxu0 %v3483_v48  ;;  %2518 = vmatprep.subr.bf16.mxu1 %v3486_v49  ;;  %v3552_v48 = vld [vmem:[#allocation4 + $0x3ec] ss:$16 sps:$4 sm:$0xff]  }
 0x148   :  { %2355 = vmatpush1.bf16.msra.mxu0 %v3481_v50  ;;  %2519 = vmatpush1.bf16.msra.mxu1 %v3484_v51  ;;  %v990_v50 = vmax.f32 %v900_v45, 0.0  ;;  %v3547_v51 = vld [vmem:[#allocation4 + $0x3e0] ss:$16 sps:$4 sm:$0xff]   ;;  %v3616_v45 = vld [vmem:[#allocation4 + $0x548] ss:$16 sps:$4 sm:$0xff]  }
 0x149   :  { %2356 = vmatprep.subr.bf16.mxu0 %v3489_v52  ;;  %2520 = vmatprep.subr.bf16.mxu1 %v3492_v53  ;;  %v3550_v52 = vld [vmem:[#allocation4 + $0x3e8] ss:$16 sps:$4 sm:$0xff]   ;;  %v3555_v53 = vld [vmem:[#allocation4 + $0x404] ss:$16 sps:$4 sm:$0xff]  }
 0x14c   :  { %2357 = vmatpush1.bf16.msra.mxu0 %v3487_v54  ;;  %2521 = vmatpush1.bf16.msra.mxu1 %v3490_v55  ;;  %v3558_v54 = vld [vmem:[#allocation4 + $0x40c] ss:$16 sps:$4 sm:$0xff]   ;;  %v998_v55 = vpack.c.bf16 %v990_v50, %v990_v50 }
 0x14d   :  { %2358 = vmatprep.subr.bf16.mxu0 %v3495_v56  ;;  %2522 = vmatprep.subr.bf16.mxu1 %v3498_v57  ;;  %v3553_v56 = vld [vmem:[#allocation4 + $0x400] ss:$16 sps:$4 sm:$0xff]   ;;  %v3556_v57 = vld [vmem:[#allocation4 + $0x408] ss:$16 sps:$4 sm:$0xff]   ;;  %v3630_v50 = vld [vmem:[#allocation4 + $0x58c] ss:$16 sps:$4 sm:$0xff]  }
 0x14e   :  { %v3975_v62 = vpop.f32.mrb[4].mxu0 }
 0x14f   :  { %v3977_v63 = vpop.f32.mrb[5].mxu0  ;;  %v3979_v10 = vpop.f32.mrb[4].mxu1 }
 0x150   :  { %2359 = vmatpush1.bf16.msra.mxu0 %v3493_v58  ;;  %2523 = vmatpush1.bf16.msra.mxu1 %v3496_v59  ;;  %v944_v3 = vpop.f32.mrb[6].mxu0  ;;  %v3981_v17 = vpop.f32.mrb[5].mxu1  ;;  %v943_v49 = vadd.f32 %v3977_v63, %v487_v44  ;;  %v3561_v58 = vld [vmem:[#allocation4 + $0x424] ss:$16 sps:$4 sm:$0xff]   ;;  %v3564_v59 = vld [vmem:[#allocation4 + $0x42c] ss:$16 sps:$4 sm:$0xff]  }
 0x151   :  { %2360 = vmatprep.subr.bf16.mxu0 %v3501_v60  ;;  %2524 = vmatprep.subr.bf16.mxu1 %v3504_v61  ;;  %v945_v6 = vpop.f32.mrb[7].mxu0  ;;  %v985_v19 = vpop.f32.mrb[6].mxu1  ;;  %v3559_v61 = vld [vmem:[#allocation4 + $0x420] ss:$16 sps:$4 sm:$0xff]   ;;  %v3562_v63 = vld [vmem:[#allocation4 + $0x428] ss:$16 sps:$4 sm:$0xff]  }
 0x152   :  { %v986_v20 = vpop.f32.mrb[7].mxu1  ;;  %v993_v29 = vmax.f32 %v943_v49, 0.0  ;;  %v3565_v3 = vld [vmem:[#allocation4 + $0x440] ss:$16 sps:$4 sm:$0xff]   ;;  %v3576_v6 = vld [vmem:[#allocation4 + $0x46c] ss:$16 sps:$4 sm:$0xff]  }
 0x153   :  { %v3577_v19 = vld [vmem:[#allocation4 + $0x480] ss:$16 sps:$4 sm:$0xff]   ;;  %v3580_v20 = vld [vmem:[#allocation4 + $0x488] ss:$16 sps:$4 sm:$0xff]   ;;  %v3627_v49 = vld [vmem:[#allocation4 + $0x584] ss:$16 sps:$4 sm:$0xff]  }
 0x154   :  { %2361 = vmatpush1.bf16.msra.mxu0 %v3499_v1  ;;  %2525 = vmatpush1.bf16.msra.mxu1 %v3502_v2  ;;  %v1001_v60 = vpack.c.bf16 %v993_v29, %v993_v29  ;;  %v3567_v1 = vld [vmem:[#allocation4 + $0x444] ss:$16 sps:$4 sm:$0xff]   ;;  %v3570_v2 = vld [vmem:[#allocation4 + $0x44c] ss:$16 sps:$4 sm:$0xff]   ;;  %v3613_v44 = vld [vmem:[#allocation4 + $0x540] ss:$16 sps:$4 sm:$0xff]  }
 0x155   :  { %2362 = vmatprep.subr.bf16.mxu0 %v3507_v4  ;;  %2526 = vmatprep.subr.bf16.mxu1 %v3510_v5  ;;  %v3568_v4 = vld [vmem:[#allocation4 + $0x448] ss:$16 sps:$4 sm:$0xff]   ;;  %v3573_v5 = vld [vmem:[#allocation4 + $0x464] ss:$16 sps:$4 sm:$0xff]   ;;  %v3636_v29 = vld [vmem:[#allocation4 + $0x5ac] ss:$16 sps:$4 sm:$0xff]  }
 0x158   :  { %2363 = vmatpush1.bf16.msra.mxu0 %v3505_v7  ;;  %2527 = vmatpush1.bf16.msra.mxu1 %v3508_v8  ;;  %v3571_v7 = vld [vmem:[#allocation4 + $0x460] ss:$16 sps:$4 sm:$0xff]   ;;  %v3574_v8 = vld [vmem:[#allocation4 + $0x468] ss:$16 sps:$4 sm:$0xff]  }
 0x159   :  { %2364 = vmatprep.subr.bf16.mxu0 %v3513_v15  ;;  %2528 = vmatprep.subr.bf16.mxu1 %v3516_v16  ;;  %v3579_v15 = vld [vmem:[#allocation4 + $0x484] ss:$16 sps:$4 sm:$0xff]   ;;  %v3582_v16 = vld [vmem:[#allocation4 + $0x48c] ss:$16 sps:$4 sm:$0xff]  }
 0x15c   :  { %2365 = vmatpush1.bf16.msra.mxu0 %v3511_v21  ;;  %2529 = vmatpush1.bf16.msra.mxu1 %v3514_v22  ;;  %v3585_v21 = vld [vmem:[#allocation4 + $0x4a4] ss:$16 sps:$4 sm:$0xff]   ;;  %v3588_v22 = vld [vmem:[#allocation4 + $0x4ac] ss:$16 sps:$4 sm:$0xff]  }
 0x15d   :  { %2366 = vmatprep.subr.bf16.mxu0 %v3519_v23  ;;  %2530 = vmatprep.subr.bf16.mxu1 %v3522_v24  ;;  %v3583_v23 = vld [vmem:[#allocation4 + $0x4a0] ss:$16 sps:$4 sm:$0xff]   ;;  %v3586_v24 = vld [vmem:[#allocation4 + $0x4a8] ss:$16 sps:$4 sm:$0xff]  }
 0x160   :  { %2367 = vmatpush1.bf16.msra.mxu0 %v3517_v25  ;;  %2531 = vmatpush1.bf16.msra.mxu1 %v3520_v26  ;;  %v3591_v25 = vld [vmem:[#allocation4 + $0x4c4] ss:$16 sps:$4 sm:$0xff]   ;;  %v3594_v26 = vld [vmem:[#allocation4 + $0x4cc] ss:$16 sps:$4 sm:$0xff]  }
 0x161   :  { %2368 = vmatprep.subr.bf16.mxu0 %v3525_v27  ;;  %2532 = vmatprep.subr.bf16.mxu1 %v3528_v9  ;;  %v3589_v27 = vld [vmem:[#allocation4 + $0x4c0] ss:$16 sps:$4 sm:$0xff]   ;;  %v3592_v9 = vld [vmem:[#allocation4 + $0x4c8] ss:$16 sps:$4 sm:$0xff]  }
 0x164   :  { %2369 = vmatpush1.bf16.msra.mxu0 %v3523_v28  ;;  %2533 = vmatpush1.bf16.msra.mxu1 %v3526_v30  ;;  %v3597_v28 = vld [vmem:[#allocation4 + $0x4e4] ss:$16 sps:$4 sm:$0xff]   ;;  %v3600_v30 = vld [vmem:[#allocation4 + $0x4ec] ss:$16 sps:$4 sm:$0xff]  }
 0x165   :  { %2370 = vmatprep.subr.bf16.mxu0 %v3531_v31  ;;  %2534 = vmatprep.subr.bf16.mxu1 %v3534_v32  ;;  %v3595_v31 = vld [vmem:[#allocation4 + $0x4e0] ss:$16 sps:$4 sm:$0xff]   ;;  %v3598_v32 = vld [vmem:[#allocation4 + $0x4e8] ss:$16 sps:$4 sm:$0xff]  }
 0x168   :  { %2371 = vmatpush1.bf16.msra.mxu0 %v3529_v34  ;;  %2535 = vmatpush1.bf16.msra.mxu1 %v3532_v35  ;;  %v3603_v34 = vld [vmem:[#allocation4 + $0x504] ss:$16 sps:$4 sm:$0xff]   ;;  %v3606_v35 = vld [vmem:[#allocation4 + $0x50c] ss:$16 sps:$4 sm:$0xff]  }
 0x169   :  { %2372 = vmatprep.subr.bf16.mxu0 %v3537_v36  ;;  %2536 = vmatprep.subr.bf16.mxu1 %v3540_v37  ;;  %v3601_v36 = vld [vmem:[#allocation4 + $0x500] ss:$16 sps:$4 sm:$0xff]   ;;  %v3604_v37 = vld [vmem:[#allocation4 + $0x508] ss:$16 sps:$4 sm:$0xff]  }
 0x16c   :  { %2373 = vmatpush1.bf16.msra.mxu0 %v3535_v40  ;;  %2537 = vmatpush1.bf16.msra.mxu1 %v3538_v41  ;;  %v3607_v40 = vld [vmem:[#allocation4 + $0x520] ss:$16 sps:$4 sm:$0xff]   ;;  %v3610_v41 = vld [vmem:[#allocation4 + $0x528] ss:$16 sps:$4 sm:$0xff]  }
 0x16d   :  { %2374 = vmatprep.subr.bf16.mxu0 %v3543_v42  ;;  %2538 = vmatprep.subr.bf16.mxu1 %v3546_v43  ;;  %v3615_v42 = vld [vmem:[#allocation4 + $0x544] ss:$16 sps:$4 sm:$0xff]   ;;  %v3618_v43 = vld [vmem:[#allocation4 + $0x54c] ss:$16 sps:$4 sm:$0xff]  }
 0x170   :  { %2375 = vmatpush1.bf16.msra.mxu0 %v3541_v0  ;;  %2539 = vmatpush1.bf16.msra.mxu1 %v3544_v46  ;;  %v3621_v0 = vld [vmem:[#allocation4 + $0x564] ss:$16 sps:$4 sm:$0xff]   ;;  %v3624_v46 = vld [vmem:[#allocation4 + $0x56c] ss:$16 sps:$4 sm:$0xff]  }
 0x171   :  { %2376 = vmatprep.subr.bf16.mxu0 %v3549_v47  ;;  %2540 = vmatprep.subr.bf16.mxu1 %v3552_v48  ;;  %v3619_v47 = vld [vmem:[#allocation4 + $0x560] ss:$16 sps:$4 sm:$0xff]   ;;  %v3622_v48 = vld [vmem:[#allocation4 + $0x568] ss:$16 sps:$4 sm:$0xff]  }
 0x174   :  { %2377 = vmatpush1.bf16.msra.mxu0 %v3547_v51  ;;  %2541 = vmatpush1.bf16.msra.mxu1 %v3550_v52  ;;  %v482_v51 = vsub.s32 4, %v3954_v11  ;;  %v3625_v52 = vld [vmem:[#allocation4 + $0x580] ss:$16 sps:$4 sm:$0xff]  }
 0x175   :  { %2387 = vmatprep.subr.bf16.mxu0 %v3555_v53  ;;  %2551 = vmatprep.subr.bf16.mxu1 %v3558_v54  ;;  %v3628_v53 = vld [vmem:[#allocation4 + $0x588] ss:$16 sps:$4 sm:$0xff]   ;;  %v3633_v54 = vld [vmem:[#allocation4 + $0x5a4] ss:$16 sps:$4 sm:$0xff]  }
 0x177   :  { %2379 = vmatmul.mubr.bf16.vlgmr.msra.gmra.mrb[8].mxu0 %v998_v55  ;;  %2543 = vmatmul.mubr.bf16.vlgmr.msra.gmra.mrb[8].mxu1 %v998_v55  ;;  %v494_v55 = vsub.s32 7, %v3954_v11 }
 0x178   :  { %2388 = vmatpush1.bf16.msra.mxu0 %v3553_v56  ;;  %2552 = vmatpush1.bf16.msra.mxu1 %v3556_v57  ;;  %v483_v56 = vrot.slane %v3960_v13, %v482_v51  ;;  %v3631_v57 = vld [vmem:[#allocation4 + $0x5a0] ss:$16 sps:$4 sm:$0xff]   ;;  %v3702_v51 = vld [vmem:[#allocation4 + $0x70c] ss:$16 sps:$4 sm:$0xff]  }
 0x179   :  { %2389 = vmatprep.subr.bf16.mxu0 %v3561_v58  ;;  %2553 = vmatprep.subr.bf16.mxu1 %v3564_v59  ;;  %v3634_v58 = vld [vmem:[#allocation4 + $0x5a8] ss:$16 sps:$4 sm:$0xff]   ;;  %v3639_v59 = vld [vmem:[#allocation4 + $0x5c4] ss:$16 sps:$4 sm:$0xff]  }
 0x17a   :  { %2419 = vmatprep.mubr.bf16.mxu0 %v1001_v60  ;;  %2583 = vmatprep.mubr.bf16.mxu1 %v1001_v60  ;;  %v3642_v60 = vld [vmem:[#allocation4 + $0x5cc] ss:$16 sps:$4 sm:$0xff]  }
 0x17c   :  { %2390 = vmatpush1.bf16.msra.mxu0 %v3559_v61  ;;  %2554 = vmatpush1.bf16.msra.mxu1 %v3562_v63  ;;  %v495_v61 = vrot.slane %v3960_v13, %v494_v55  ;;  %v941_v63 = vadd.f32 %v3975_v62, %v483_v56  ;;  %v3703_v55 = vld [vmem:[#allocation4 + $0x720] ss:$16 sps:$4 sm:$0xff]   ;;  %v3706_v56 = vld [vmem:[#allocation4 + $0x728] ss:$16 sps:$4 sm:$0xff]  }
 0x17d   :  { %2391 = vmatprep.subr.bf16.mxu0 %v3567_v1  ;;  %2555 = vmatprep.subr.bf16.mxu1 %v3570_v2  ;;  %v3637_v1 = vld [vmem:[#allocation4 + $0x5c0] ss:$16 sps:$4 sm:$0xff]   ;;  %v3640_v2 = vld [vmem:[#allocation4 + $0x5c8] ss:$16 sps:$4 sm:$0xff]  }
 0x180   :  { %2392 = vmatpush1.bf16.msra.mxu0 %v3565_v3  ;;  %2556 = vmatpush1.bf16.msra.mxu1 %v3568_v4  ;;  %v3645_v3 = vld [vmem:[#allocation4 + $0x5e4] ss:$16 sps:$4 sm:$0xff]   ;;  %v3648_v4 = vld [vmem:[#allocation4 + $0x5ec] ss:$16 sps:$4 sm:$0xff]  }
 0x181   :  { %2393 = vmatprep.subr.bf16.mxu0 %v3573_v5  ;;  %2557 = vmatprep.subr.bf16.mxu1 %v3576_v6  ;;  %v984_v5 = vadd.f32 %v3981_v17, %v495_v61  ;;  %v992_v6 = vmax.f32 %v941_v63, 0.0  ;;  %v3717_v61 = vld [vmem:[#allocation4 + $0x764] ss:$16 sps:$4 sm:$0xff]   ;;  %v3720_v63 = vld [vmem:[#allocation4 + $0x76c] ss:$16 sps:$4 sm:$0xff]  }
 0x183   :  { %v995_v62 = vmax.f32 %v984_v5, 0.0  ;;  %v3721_v5 = vld [vmem:[#allocation4 + $0x780] ss:$16 sps:$4 sm:$0xff]  }
 0x184   :  { %2394 = vmatpush1.bf16.msra.mxu0 %v3571_v7  ;;  %2558 = vmatpush1.bf16.msra.mxu1 %v3574_v8  ;;  %v3643_v7 = vld [vmem:[#allocation4 + $0x5e0] ss:$16 sps:$4 sm:$0xff]   ;;  %v3646_v8 = vld [vmem:[#allocation4 + $0x5e8] ss:$16 sps:$4 sm:$0xff]  }
 0x185   :  { %2395 = vmatprep.subr.bf16.mxu0 %v3579_v15  ;;  %2559 = vmatprep.subr.bf16.mxu1 %v3582_v16  ;;  %v3651_v15 = vld [vmem:[#allocation4 + $0x604] ss:$16 sps:$4 sm:$0xff]   ;;  %v3654_v16 = vld [vmem:[#allocation4 + $0x60c] ss:$16 sps:$4 sm:$0xff]   ;;  %v1003_v17 = vpack.c.bf16 %v995_v62, %v995_v62  ;;  %v3730_v62 = vld [vmem:[#allocation4 + $0x7a8] ss:$16 sps:$4 sm:$0xff]  }
 0x188   :  { %2396 = vmatpush1.bf16.msra.mxu0 %v3577_v19  ;;  %2560 = vmatpush1.bf16.msra.mxu1 %v3580_v20  ;;  %v1000_v19 = vpack.c.bf16 %v992_v6, %v992_v6  ;;  %v3649_v20 = vld [vmem:[#allocation4 + $0x600] ss:$16 sps:$4 sm:$0xff]   ;;  %v3724_v6 = vld [vmem:[#allocation4 + $0x788] ss:$16 sps:$4 sm:$0xff]  }
 0x189   :  { %2397 = vmatprep.subr.bf16.mxu0 %v3585_v21  ;;  %2561 = vmatprep.subr.bf16.mxu1 %v3588_v22  ;;  %v3652_v21 = vld [vmem:[#allocation4 + $0x608] ss:$16 sps:$4 sm:$0xff]   ;;  %v3657_v22 = vld [vmem:[#allocation4 + $0x624] ss:$16 sps:$4 sm:$0xff]  }
 0x18c   :  { %2398 = vmatpush1.bf16.msra.mxu0 %v3583_v23  ;;  %2562 = vmatpush1.bf16.msra.mxu1 %v3586_v24  ;;  %v3660_v23 = vld [vmem:[#allocation4 + $0x62c] ss:$16 sps:$4 sm:$0xff]   ;;  %v3655_v24 = vld [vmem:[#allocation4 + $0x620] ss:$16 sps:$4 sm:$0xff]  }
 0x18d   :  { %2399 = vmatprep.subr.bf16.mxu0 %v3591_v25  ;;  %2563 = vmatprep.subr.bf16.mxu1 %v3594_v26  ;;  %v3658_v25 = vld [vmem:[#allocation4 + $0x628] ss:$16 sps:$4 sm:$0xff]   ;;  %v3663_v26 = vld [vmem:[#allocation4 + $0x644] ss:$16 sps:$4 sm:$0xff]  }
 0x190   :  { %2400 = vmatpush1.bf16.msra.mxu0 %v3589_v27  ;;  %2564 = vmatpush1.bf16.msra.mxu1 %v3592_v9  ;;  %v3666_v27 = vld [vmem:[#allocation4 + $0x64c] ss:$16 sps:$4 sm:$0xff]   ;;  %v3661_v9 = vld [vmem:[#allocation4 + $0x640] ss:$16 sps:$4 sm:$0xff]  }
 0x191   :  { %2401 = vmatprep.subr.bf16.mxu0 %v3597_v28  ;;  %2565 = vmatprep.subr.bf16.mxu1 %v3600_v30  ;;  %v3664_v28 = vld [vmem:[#allocation4 + $0x648] ss:$16 sps:$4 sm:$0xff]   ;;  %v3669_v30 = vld [vmem:[#allocation4 + $0x664] ss:$16 sps:$4 sm:$0xff]  }
 0x194   :  { %2402 = vmatpush1.bf16.msra.mxu0 %v3595_v31  ;;  %2566 = vmatpush1.bf16.msra.mxu1 %v3598_v32  ;;  %v3672_v31 = vld [vmem:[#allocation4 + $0x66c] ss:$16 sps:$4 sm:$0xff]   ;;  %v3667_v32 = vld [vmem:[#allocation4 + $0x660] ss:$16 sps:$4 sm:$0xff]  }
 0x195   :  { %2403 = vmatprep.subr.bf16.mxu0 %v3603_v34  ;;  %2567 = vmatprep.subr.bf16.mxu1 %v3606_v35  ;;  %v3670_v34 = vld [vmem:[#allocation4 + $0x668] ss:$16 sps:$4 sm:$0xff]   ;;  %v3675_v35 = vld [vmem:[#allocation4 + $0x684] ss:$16 sps:$4 sm:$0xff]  }
 0x198   :  { %2404 = vmatpush1.bf16.msra.mxu0 %v3601_v36  ;;  %2568 = vmatpush1.bf16.msra.mxu1 %v3604_v37  ;;  %v3678_v36 = vld [vmem:[#allocation4 + $0x68c] ss:$16 sps:$4 sm:$0xff]   ;;  %v3673_v37 = vld [vmem:[#allocation4 + $0x680] ss:$16 sps:$4 sm:$0xff]  }
 0x199   :  { %2405 = vmatprep.subr.bf16.mxu0 %v3609_v38  ;;  %2569 = vmatprep.subr.bf16.mxu1 %v3612_v39  ;;  %v3676_v38 = vld [vmem:[#allocation4 + $0x688] ss:$16 sps:$4 sm:$0xff]   ;;  %v3681_v39 = vld [vmem:[#allocation4 + $0x6a4] ss:$16 sps:$4 sm:$0xff]  }
 0x19c   :  { %2406 = vmatpush1.bf16.msra.mxu0 %v3607_v40  ;;  %2570 = vmatpush1.bf16.msra.mxu1 %v3610_v41  ;;  %v3684_v40 = vld [vmem:[#allocation4 + $0x6ac] ss:$16 sps:$4 sm:$0xff]   ;;  %v3679_v41 = vld [vmem:[#allocation4 + $0x6a0] ss:$16 sps:$4 sm:$0xff]  }
 0x19d   :  { %2407 = vmatprep.subr.bf16.mxu0 %v3615_v42  ;;  %2571 = vmatprep.subr.bf16.mxu1 %v3618_v43  ;;  %v3682_v42 = vld [vmem:[#allocation4 + $0x6a8] ss:$16 sps:$4 sm:$0xff]   ;;  %v3687_v43 = vld [vmem:[#allocation4 + $0x6c4] ss:$16 sps:$4 sm:$0xff]  }
 0x1a0   :  { %2408 = vmatpush1.bf16.msra.mxu0 %v3613_v44  ;;  %2572 = vmatpush1.bf16.msra.mxu1 %v3616_v45  ;;  %v3690_v44 = vld [vmem:[#allocation4 + $0x6cc] ss:$16 sps:$4 sm:$0xff]   ;;  %v3685_v45 = vld [vmem:[#allocation4 + $0x6c0] ss:$16 sps:$4 sm:$0xff]  }
 0x1a1   :  { %2409 = vmatprep.subr.bf16.mxu0 %v3621_v0  ;;  %2573 = vmatprep.subr.bf16.mxu1 %v3624_v46  ;;  %v3688_v0 = vld [vmem:[#allocation4 + $0x6c8] ss:$16 sps:$4 sm:$0xff]   ;;  %v3693_v46 = vld [vmem:[#allocation4 + $0x6e4] ss:$16 sps:$4 sm:$0xff]  }
 0x1a4   :  { %2410 = vmatpush1.bf16.msra.mxu0 %v3619_v47  ;;  %2574 = vmatpush1.bf16.msra.mxu1 %v3622_v48  ;;  %v3696_v47 = vld [vmem:[#allocation4 + $0x6ec] ss:$16 sps:$4 sm:$0xff]   ;;  %v3691_v48 = vld [vmem:[#allocation4 + $0x6e0] ss:$16 sps:$4 sm:$0xff]  }
 0x1a5   :  { %2411 = vmatprep.subr.bf16.mxu0 %v3627_v49  ;;  %2575 = vmatprep.subr.bf16.mxu1 %v3630_v50  ;;  %v3694_v49 = vld [vmem:[#allocation4 + $0x6e8] ss:$16 sps:$4 sm:$0xff]   ;;  %v3699_v50 = vld [vmem:[#allocation4 + $0x704] ss:$16 sps:$4 sm:$0xff]  }
 0x1a8   :  { %2412 = vmatpush1.bf16.msra.mxu0 %v3625_v52  ;;  %2576 = vmatpush1.bf16.msra.mxu1 %v3628_v53  ;;  %v3697_v52 = vld [vmem:[#allocation4 + $0x700] ss:$16 sps:$4 sm:$0xff]   ;;  %v3700_v53 = vld [vmem:[#allocation4 + $0x708] ss:$16 sps:$4 sm:$0xff]  }
 0x1a9   :  { %2413 = vmatprep.subr.bf16.mxu0 %v3633_v54  ;;  %2577 = vmatprep.subr.bf16.mxu1 %v3636_v29  ;;  %v3705_v54 = vld [vmem:[#allocation4 + $0x724] ss:$16 sps:$4 sm:$0xff]   ;;  %v3708_v29 = vld [vmem:[#allocation4 + $0x72c] ss:$16 sps:$4 sm:$0xff]  }
 0x1ac   :  { %2414 = vmatpush1.bf16.msra.mxu0 %v3631_v57  ;;  %2578 = vmatpush1.bf16.msra.mxu1 %v3634_v58  ;;  %v3711_v57 = vld [vmem:[#allocation4 + $0x744] ss:$16 sps:$4 sm:$0xff]   ;;  %v3714_v58 = vld [vmem:[#allocation4 + $0x74c] ss:$16 sps:$4 sm:$0xff]  }
 0x1ad   :  { %2415 = vmatprep.subr.bf16.mxu0 %v3639_v59  ;;  %2579 = vmatprep.subr.bf16.mxu1 %v3642_v60  ;;  %v3709_v59 = vld [vmem:[#allocation4 + $0x740] ss:$16 sps:$4 sm:$0xff]   ;;  %v3712_v60 = vld [vmem:[#allocation4 + $0x748] ss:$16 sps:$4 sm:$0xff]  }
 0x1b0   :  { %2416 = vmatpush1.bf16.msra.mxu0 %v3637_v1  ;;  %2580 = vmatpush1.bf16.msra.mxu1 %v3640_v2  ;;  %v3715_v1 = vld [vmem:[#allocation4 + $0x760] ss:$16 sps:$4 sm:$0xff]   ;;  %v3718_v2 = vld [vmem:[#allocation4 + $0x768] ss:$16 sps:$4 sm:$0xff]  }
 0x1b1   :  { %2417 = vmatprep.subr.bf16.mxu0 %v3645_v3  ;;  %2581 = vmatprep.subr.bf16.mxu1 %v3648_v4  ;;  %v3723_v3 = vld [vmem:[#allocation4 + $0x784] ss:$16 sps:$4 sm:$0xff]   ;;  %v3726_v4 = vld [vmem:[#allocation4 + $0x78c] ss:$16 sps:$4 sm:$0xff]  }
 0x1b4   :  { %2418 = vmatpush1.bf16.msra.mxu0 %v3643_v7  ;;  %2582 = vmatpush1.bf16.msra.mxu1 %v3646_v8  ;;  %v490_v7 = vsub.s32 6, %v3954_v11  ;;  %v3729_v8 = vld [vmem:[#allocation4 + $0x7a4] ss:$16 sps:$4 sm:$0xff]  }
 0x1b5   :  { %2428 = vmatprep.subr.bf16.mxu0 %v3651_v15  ;;  %2592 = vmatprep.subr.bf16.mxu1 %v3654_v16  ;;  %v3732_v15 = vld [vmem:[#allocation4 + $0x7ac] ss:$16 sps:$4 sm:$0xff]   ;;  %v3727_v16 = vld [vmem:[#allocation4 + $0x7a0] ss:$16 sps:$4 sm:$0xff]  }
 0x1b7   :  { %2420 = vmatmul.mubr.bf16.vlgmr.msra.gmra.mrb[8].mxu0 %v1000_v19  ;;  %2584 = vmatmul.mubr.bf16.vlgmr.msra.gmra.mrb[8].mxu1 %v1000_v19  ;;  %v491_v19 = vrot.slane %v3960_v13, %v490_v7  ;;  %v3745_v13 = vld [vmem:[#allocation6 + $0x40] sm:$0xff]  }
 0x1b8   :  { %2429 = vmatpush1.bf16.msra.mxu0 %v3649_v20  ;;  %2593 = vmatpush1.bf16.msra.mxu1 %v3652_v21  ;;  %v3735_v20 = vld [vmem:[#allocation4 + $0x7c4] ss:$16 sps:$4 sm:$0xff]   ;;  %v3738_v21 = vld [vmem:[#allocation4 + $0x7cc] ss:$16 sps:$4 sm:$0xff]  }
 0x1b9   :  { %2430 = vmatprep.subr.bf16.mxu0 %v3657_v22  ;;  %2594 = vmatprep.subr.bf16.mxu1 %v3660_v23  ;;  %v3733_v22 = vld [vmem:[#allocation4 + $0x7c0] ss:$16 sps:$4 sm:$0xff]   ;;  %v3736_v23 = vld [vmem:[#allocation4 + $0x7c8] ss:$16 sps:$4 sm:$0xff]  }
 0x1ba   :  { %2460 = vmatprep.mubr.bf16.mxu0 %v1003_v17  ;;  %2624 = vmatprep.mubr.bf16.mxu1 %v1003_v17  ;;  %v982_v17 = vadd.f32 %v3979_v10, %v491_v19  ;;  %v3749_v10 = vld [vmem:[#allocation6 + $0x48] sm:$0xff]  }
 0x1bc   :  { %2431 = vmatpush1.bf16.msra.mxu0 %v3655_v24  ;;  %2595 = vmatpush1.bf16.msra.mxu1 %v3658_v25  ;;  %v3741_v24 = vld [vmem:[#allocation4 + $0x7e4] ss:$16 sps:$4 sm:$0xff]   ;;  %v3744_v25 = vld [vmem:[#allocation4 + $0x7ec] ss:$16 sps:$4 sm:$0xff]  }
 0x1bd   :  { %2432 = vmatprep.subr.bf16.mxu0 %v3663_v26  ;;  %2596 = vmatprep.subr.bf16.mxu1 %v3666_v27  ;;  %v3739_v26 = vld [vmem:[#allocation4 + $0x7e0] ss:$16 sps:$4 sm:$0xff]   ;;  %v3742_v27 = vld [vmem:[#allocation4 + $0x7e8] ss:$16 sps:$4 sm:$0xff]  }
 0x1c0   :  { %2433 = vmatpush1.bf16.msra.mxu0 %v3661_v9  ;;  %2597 = vmatpush1.bf16.msra.mxu1 %v3664_v28  ;;  %v994_v9 = vmax.f32 %v982_v17, 0.0  ;;  %v3746_v28 = vld [vmem:[#allocation6 + $0xc0] sm:$0xff]  }
 0x1c1   :  { %2434 = vmatprep.subr.bf16.mxu0 %v3669_v30  ;;  %2598 = vmatprep.subr.bf16.mxu1 %v3672_v31  ;;  %v3747_v30 = vld [vmem:[#allocation6] sm:$0xff]  }
 0x1c2   :  { %v3748_v31 = vld [vmem:[#allocation6 + $0x80] sm:$0xff]  }
 0x1c4   :  { %2435 = vmatpush1.bf16.msra.mxu0 %v3667_v32  ;;  %2599 = vmatpush1.bf16.msra.mxu1 %v3670_v34  ;;  %v1002_v32 = vpack.c.bf16 %v994_v9, %v994_v9  ;;  %v3750_v34 = vld [vmem:[#allocation6 + $0xc8] sm:$0xff]  }
 0x1c5   :  { %2436 = vmatprep.subr.bf16.mxu0 %v3675_v35  ;;  %2600 = vmatprep.subr.bf16.mxu1 %v3678_v36  ;;  %v3751_v35 = vld [vmem:[#allocation6 + $0x8] sm:$0xff]  }
 0x1c6   :  { %v3752_v36 = vld [vmem:[#allocation6 + $0x88] sm:$0xff]  }
 0x1c8   :  { %2437 = vmatpush1.bf16.msra.mxu0 %v3673_v37  ;;  %2601 = vmatpush1.bf16.msra.mxu1 %v3676_v38  ;;  %v3753_v37 = vld [vmem:[#allocation6 + $0x50] sm:$0xff]  }
 0x1c9   :  { %2438 = vmatprep.subr.bf16.mxu0 %v3681_v39  ;;  %2602 = vmatprep.subr.bf16.mxu1 %v3684_v40  ;;  %v3754_v38 = vld [vmem:[#allocation6 + $0xd0] sm:$0xff]  }
 0x1ca   :  { %v3755_v39 = vld [vmem:[#allocation6 + $0x10] sm:$0xff]  }
 0x1cb   :  { %v3756_v40 = vld [vmem:[#allocation6 + $0x90] sm:$0xff]  }
 0x1cc   :  { %2439 = vmatpush1.bf16.msra.mxu0 %v3679_v41  ;;  %2603 = vmatpush1.bf16.msra.mxu1 %v3682_v42  ;;  %v3757_v41 = vld [vmem:[#allocation6 + $0x58] sm:$0xff]  }
 0x1cd   :  { %2440 = vmatprep.subr.bf16.mxu0 %v3687_v43  ;;  %2604 = vmatprep.subr.bf16.mxu1 %v3690_v44  ;;  %v3758_v42 = vld [vmem:[#allocation6 + $0xd8] sm:$0xff]  }
 0x1ce   :  { %v3759_v43 = vld [vmem:[#allocation6 + $0x18] sm:$0xff]  }
 0x1cf   :  { %v3760_v44 = vld [vmem:[#allocation6 + $0x98] sm:$0xff]  }
 0x1d0   :  { %2441 = vmatpush1.bf16.msra.mxu0 %v3685_v45  ;;  %2605 = vmatpush1.bf16.msra.mxu1 %v3688_v0  ;;  %v3761_v45 = vld [vmem:[#allocation6 + $0x60] sm:$0xff]  }
 0x1d1   :  { %2442 = vmatprep.subr.bf16.mxu0 %v3693_v46  ;;  %2606 = vmatprep.subr.bf16.mxu1 %v3696_v47  ;;  %v3762_v0 = vld [vmem:[#allocation6 + $0xe0] sm:$0xff]  }
 0x1d2   :  { %v3763_v46 = vld [vmem:[#allocation6 + $0x20] sm:$0xff]  }
 0x1d3   :  { %v3764_v47 = vld [vmem:[#allocation6 + $0xa0] sm:$0xff]  }
 0x1d4   :  { %2443 = vmatpush1.bf16.msra.mxu0 %v3691_v48  ;;  %2607 = vmatpush1.bf16.msra.mxu1 %v3694_v49  ;;  %v3765_v48 = vld [vmem:[#allocation6 + $0x68] sm:$0xff]  }
 0x1d5   :  { %2444 = vmatprep.subr.bf16.mxu0 %v3699_v50  ;;  %2608 = vmatprep.subr.bf16.mxu1 %v3702_v51  ;;  %v3766_v49 = vld [vmem:[#allocation6 + $0xe8] sm:$0xff]  }
 0x1d6   :  { %v3767_v50 = vld [vmem:[#allocation6 + $0x28] sm:$0xff]  }
 0x1d7   :  { %v3768_v51 = vld [vmem:[#allocation6 + $0xa8] sm:$0xff]  }
 0x1d8   :  { %2445 = vmatpush1.bf16.msra.mxu0 %v3697_v52  ;;  %2609 = vmatpush1.bf16.msra.mxu1 %v3700_v53  ;;  %v3769_v52 = vld [vmem:[#allocation6 + $0x70] sm:$0xff]  }
 0x1d9   :  { %2446 = vmatprep.subr.bf16.mxu0 %v3705_v54  ;;  %2610 = vmatprep.subr.bf16.mxu1 %v3708_v29  ;;  %v3770_v53 = vld [vmem:[#allocation6 + $0xf0] sm:$0xff]  }
 0x1da   :  { %v3771_v54 = vld [vmem:[#allocation6 + $0x30] sm:$0xff]  }
 0x1db   :  { %v3772_v29 = vld [vmem:[#allocation6 + $0xb0] sm:$0xff]  }
 0x1dc   :  { %2447 = vmatpush1.bf16.msra.mxu0 %v3703_v55  ;;  %2611 = vmatpush1.bf16.msra.mxu1 %v3706_v56  ;;  %v3773_v55 = vld [vmem:[#allocation6 + $0x78] sm:$0xff]  }
 0x1dd   :  { %2448 = vmatprep.subr.bf16.mxu0 %v3711_v57  ;;  %2612 = vmatprep.subr.bf16.mxu1 %v3714_v58  ;;  %v3774_v56 = vld [vmem:[#allocation6 + $0xf8] sm:$0xff]  }
 0x1de   :  { %v3775_v57 = vld [vmem:[#allocation6 + $0x38] sm:$0xff]  }
 0x1df   :  { %v3776_v58 = vld [vmem:[#allocation6 + $0xb8] sm:$0xff]  }
 0x1e0   :  { %2449 = vmatpush1.bf16.msra.mxu0 %v3709_v59  ;;  %2613 = vmatpush1.bf16.msra.mxu1 %v3712_v60  ;;  %v392_v59 = vld [vmem:[%s4022_s5] sm:$0xf] }
 0x1e1   :  { %2450 = vmatprep.subr.bf16.mxu0 %v3717_v61  ;;  %2614 = vmatprep.subr.bf16.mxu1 %v3720_v63  ;;  %v1008_v60 = vrot.slane %v392_v59, %v466_v12  ;;  %v1016_v61 = vrot.slane %v392_v59, %v474_v33  ;;  %v1012_v63 = vrot.slane %v392_v59, %v470_v14 }
 0x1e4   :  { %2451 = vmatpush1.bf16.msra.mxu0 %v3715_v1  ;;  %2615 = vmatpush1.bf16.msra.mxu1 %v3718_v2  ;;  %v1020_v1 = vrot.slane %v392_v59, %v478_v18 }
 0x1e5   :  { %2452 = vmatprep.subr.bf16.mxu0 %v3723_v3  ;;  %2616 = vmatprep.subr.bf16.mxu1 %v3726_v4 }
 0x1e8   :  { %2453 = vmatpush1.bf16.msra.mxu0 %v3721_v5  ;;  %2617 = vmatpush1.bf16.msra.mxu1 %v3724_v6 }
 0x1e9   :  { %2454 = vmatprep.subr.bf16.mxu0 %v3729_v8  ;;  %2618 = vmatprep.subr.bf16.mxu1 %v3732_v15 }
 0x1ec   :  { %2455 = vmatpush1.bf16.msra.mxu0 %v3727_v16  ;;  %2619 = vmatpush1.bf16.msra.mxu1 %v3730_v62 }
 0x1ed   :  { %2456 = vmatprep.subr.bf16.mxu0 %v3735_v20  ;;  %2620 = vmatprep.subr.bf16.mxu1 %v3738_v21 }
 0x1f0   :  { %2457 = vmatpush1.bf16.msra.mxu0 %v3733_v22  ;;  %2621 = vmatpush1.bf16.msra.mxu1 %v3736_v23 }
 0x1f1   :  { %2458 = vmatprep.subr.bf16.mxu0 %v3741_v24  ;;  %2622 = vmatprep.subr.bf16.mxu1 %v3744_v25  ;;  %v3246_v25 = vld [vmem:[%s4024_s7] ss:$0 sm:$0xff] }
 0x1f4   :  { %2459 = vmatpush1.bf16.msra.mxu0 %v3739_v26  ;;  %2623 = vmatpush1.bf16.msra.mxu1 %v3742_v27 }
 0x1f5   :  { %3279 = vmatprep.subr.bf16.mxu0 %v3745_v13  ;;  %3301 = vmatprep.subr.bf16.mxu1 %v3746_v28 }
 0x1f7   :  { %2461 = vmatmul.mubr.bf16.vlgmr.msra.gmra.mrb[8].mxu0 %v1002_v32  ;;  %2625 = vmatmul.mubr.bf16.vlgmr.msra.gmra.mrb[8].mxu1 %v1002_v32 }
 0x1f8   :  { %3280 = vmatpush3.bf16.msra.mxu0 %v3747_v30  ;;  %3302 = vmatpush3.bf16.msra.mxu1 %v3748_v31 }
 0x1f9   :  { %3281 = vmatprep.subr.bf16.mxu0 %v3749_v10  ;;  %3303 = vmatprep.subr.bf16.mxu1 %v3750_v34 }
 0x1fc   :  { %3282 = vmatpush3.bf16.msra.mxu0 %v3751_v35  ;;  %3304 = vmatpush3.bf16.msra.mxu1 %v3752_v36 }
 0x1fd   :  { %3283 = vmatprep.subr.bf16.mxu0 %v3753_v37  ;;  %3305 = vmatprep.subr.bf16.mxu1 %v3754_v38 }
 0x200   :  { %3284 = vmatpush3.bf16.msra.mxu0 %v3755_v39  ;;  %3306 = vmatpush3.bf16.msra.mxu1 %v3756_v40 }
 0x201   :  { %3285 = vmatprep.subr.bf16.mxu0 %v3757_v41  ;;  %3307 = vmatprep.subr.bf16.mxu1 %v3758_v42 }
 0x204   :  { %3286 = vmatpush3.bf16.msra.mxu0 %v3759_v43  ;;  %3308 = vmatpush3.bf16.msra.mxu1 %v3760_v44 }
 0x205   :  { %3287 = vmatprep.subr.bf16.mxu0 %v3761_v45  ;;  %3309 = vmatprep.subr.bf16.mxu1 %v3762_v0 }
 0x208   :  { %3288 = vmatpush3.bf16.msra.mxu0 %v3763_v46  ;;  %3310 = vmatpush3.bf16.msra.mxu1 %v3764_v47 }
 0x209   :  { %3289 = vmatprep.subr.bf16.mxu0 %v3765_v48  ;;  %3311 = vmatprep.subr.bf16.mxu1 %v3766_v49 }
 0x20c   :  { %3290 = vmatpush3.bf16.msra.mxu0 %v3767_v50  ;;  %3312 = vmatpush3.bf16.msra.mxu1 %v3768_v51 }
 0x20d   :  { %3291 = vmatprep.subr.bf16.mxu0 %v3769_v52  ;;  %3313 = vmatprep.subr.bf16.mxu1 %v3770_v53 }
 0x210   :  { %3292 = vmatpush3.bf16.msra.mxu0 %v3771_v54  ;;  %3314 = vmatpush3.bf16.msra.mxu1 %v3772_v29 }
 0x211   :  { %3293 = vmatprep.subr.bf16.mxu0 %v3773_v55  ;;  %3315 = vmatprep.subr.bf16.mxu1 %v3774_v56 }
 0x214   :  { %3294 = vmatpush3.bf16.msra.mxu0 %v3775_v57  ;;  %3316 = vmatpush3.bf16.msra.mxu1 %v3776_v58 }
 0x2ca   :  { %v2462_v2 = vpop.f32.mrb[8].mxu0  ;;  %v2626_v3 = vpop.f32.mrb[8].mxu1 }
 0x2cb   :  { %v3323_v4 = vadd.f32 %v2462_v2, %v1008_v60  ;;  %v3325_v5 = vadd.f32 %v2626_v3, %v1016_v61  ;;  %v2464_v6 = vpop.f32.mrb[9].mxu0  ;;  %v2628_v7 = vpop.f32.mrb[9].mxu1 }
 0x2cc   :  { %v3324_v8 = vadd.f32 %v2464_v6, %v1012_v63  ;;  %v3326_v15 = vadd.f32 %v2628_v7, %v1020_v1  ;;  %v2466_v16 = vpop.f32.mrb[10].mxu0  ;;  %v2630_v62 = vpop.f32.mrb[10].mxu1 }
 0x2cd   :  { %v2633_v12 = vmax.f32 %v3323_v4, 0.0  ;;  %v2635_v19 = vmax.f32 %v3325_v5, 0.0  ;;  %v2467_v20 = vpop.f32.mrb[11].mxu0  ;;  %v2631_v33 = vpop.f32.mrb[11].mxu1 }
 0x2ce   :  { %v2634_v21 = vmax.f32 %v3324_v8, 0.0  ;;  %v2636_v22 = vmax.f32 %v3326_v15, 0.0 }
 0x2cf   :  { %v2637_v11 = vpack.c.bf16 %v2633_v12, %v2633_v12  ;;  %v2639_v18 = vpack.c.bf16 %v2635_v19, %v2635_v19 }
 0x2d0   :  { %v2638_v14 = vpack.c.bf16 %v2634_v21, %v2634_v21  ;;  %v2640_v23 = vpack.c.bf16 %v2636_v22, %v2636_v22 }
 0x2d2   :  { %2871 = vmatprep.mubr.bf16.mxu0 %v2638_v14  ;;  %2911 = vmatprep.mubr.bf16.mxu1 %v2640_v23 }
 0x2d3   :  { %2872 = vmatmul.mubr.bf16.vlgmr.msra.gmra.mrb[12].mxu0 %v2637_v11  ;;  %2912 = vmatmul.mubr.bf16.vlgmr.msra.gmra.mrb[12].mxu1 %v2639_v18 }
 0x3a6   :  { %v3295_v17 = vpop.f32.mrb[12].mxu0  ;;  %v3317_v24 = vpop.f32.mrb[12].mxu1 }
 0x3a7   :  { %v3296_v26 = vpop.f32.mrb[13].mxu0  ;;  %v3318_v27 = vpop.f32.mrb[13].mxu1 }
 0x3a8   :  { %v3297_v9 = vadd.f32 %v3296_v26, %v3295_v17  ;;  %v3319_v13 = vadd.f32 %v3318_v27, %v3317_v24  ;;  %v3298_v28 = vpop.f32.mrb[14].mxu0  ;;  %v3320_v30 = vpop.f32.mrb[14].mxu1 }
 0x3a9   :  { %v3299_v31 = vpop.f32.mrb[15].mxu0  ;;  %v3321_v32 = vpop.f32.mrb[15].mxu1 }
 0x3aa   :  { %v2874_v10 = vadd.f32 %v3297_v9, %v3246_v25 }
 0x3ac   :  { %v2914_v34 = vadd.f32 %v3319_v13, %v2874_v10 }
 0x3ae   :  { %2919 = vst [vmem:[%s4025_s8] sm:$0xff] %v2914_v34 }
 0x3af   :  { %2924 = vsyncpa [#allocation3], 1 }
 0x3b0   :  { %2925 = vsyncpa [#allocation5], 1 }

</bundles_post_ra>
